<compile_context>
chip_gen: v7x
topology: tpu7x:2x2x1
jax: 0.10.0
libtpu: 0.0.40
codegen_flags: <defaults>
</compile_context>

<pallas_src>
import math

import numpy as np
import jax
import jax.numpy as jnp
from jax.experimental import pallas as pl
from jax.experimental.pallas import tpu as pltpu

GAUSS5 = np.array([1.0, 4.0, 6.0, 4.0, 1.0], dtype=np.float64) / 16.0


def _reflect101(i, n):
    # OpenCV BORDER_REFLECT_101:  gfedcb | abcdefgh | gfedcba
    if n == 1:
        return 0
    while i < 0 or i >= n:
        if i < 0:
            i = -i
        if i >= n:
            i = 2 * n - 2 - i
    return i


def pyr_down_matrix(n):
    """(ceil(n/2), n): 5-tap Gaussian blur + take-every-other (cv2.pyrDown)."""
    m = (n + 1) // 2
    D = np.zeros((m, n), dtype=np.float64)
    for i in range(m):
        for t in range(5):
            D[i, _reflect101(2 * i + t - 2, n)] += GAUSS5[t]
    return D


def pyr_up_matrix(n):
    """(2n, n): zero-upsample + 2x-scaled 5-tap Gaussian blur (cv2.pyrUp)."""
    N = 2 * n
    U = np.zeros((N, n), dtype=np.float64)
    for i in range(N):
        for t in range(5):
            m = _reflect101(i + t - 2, N)
            if m % 2 == 0:
                U[i, m // 2] += 2.0 * GAUSS5[t]
    return U


def _make_kernel(P, H, W):
    """Build the kernel with the plane tile P and per-level widths baked in."""
    H2, H4, H8 = H // 2, H // 4, H // 8
    W2, W4, W8 = W // 2, W // 4, W // 8
    f32, bf16 = jnp.float32, jnp.bfloat16
    inv255 = np.float32(1.0 / 255.0)

    def round_u8(x):
        # TODO(synk): cv2 uses cvRound (round-half-to-even); this is half-up.
        # Result is an exact integer in [0, 255] -> bf16-exact.
        return jnp.clip(jnp.floor(x + 0.5), 0.0, 255.0).astype(bf16)

    def col_pass(t, c_ref, wk):
        # t: (rows, P*wk) f32 row-pass result (multiples of 1/16 or 1/8, <=255,
        # NOT bf16-exact) -> split into hi+lo bf16 parts so both column matmuls
        # are bf16-exact at native MXU rate.  One SHARED (wk, wk') operator is
        # applied per plane: exactly the needed FLOPs (no kron zeros).
        c = c_ref[...]
        t_hi = t.astype(bf16)
        t_lo = (t - t_hi.astype(f32)).astype(bf16)
        outs = []
        for p in range(P):                       # static, P is a Python int
            hi = t_hi[:, p * wk:(p + 1) * wk]
            lo = t_lo[:, p * wk:(p + 1) * wk]
            outs.append(jnp.dot(hi, c, preferred_element_type=f32) +
                        jnp.dot(lo, c, preferred_element_type=f32))
        return outs[0] if P == 1 else jnp.concatenate(outs, axis=-1)

    def lap_write(out_ref, g_prev, e):
        # cv2.subtract on uint8 saturates at 0; ToTensor divides by 255.
        # g_prev / e are exact integers <=255 in bf16 -> the difference is
        # bf16-exact; the *(1/255) scaling is done in f32.
        d = jnp.clip((g_prev - e).astype(f32), 0.0, 255.0)
        out_ref[0] = (d * inv255).astype(out_ref.dtype)

    def kernel(x_ref, r0, r1, r2, r3, cd1, cd2, cd3, cu1, cu2, cu3,
               l1_ref, l2_ref, l3_ref, l4_ref):
        # torchvision ToPILImage on float does mul(255).byte() -> truncation.
        g0 = jnp.clip(jnp.floor(x_ref[0] * 255.0), 0.0, 255.0).astype(bf16)

        # level-1 pyrDown.
        t0 = jnp.dot(r0[...], g0, preferred_element_type=f32)       # (H2, P*W)
        g1 = round_u8(col_pass(t0, cd1, W))                         # (H2, P*W2)

        # stacked row pass on g1: [down -> g2 ; up -> e1], then interleave the
        # l1 write so g0/e1 (the full-res slabs) die before later levels.
        t1 = jnp.dot(r1[...], g1, preferred_element_type=f32)       # (H4+H, P*W2)
        g2 = round_u8(col_pass(t1[:H4], cd2, W2))                   # (H4, P*W4)
        e1 = round_u8(col_pass(t1[H4:], cu1, W2))                   # (H,  P*W)
        lap_write(l1_ref, g0, e1)

        # stacked row pass on g2: [down -> g3 ; up -> e2].
        t2 = jnp.dot(r2[...], g2, preferred_element_type=f32)       # (H8+H2, P*W4)
        g3 = round_u8(col_pass(t2[:H8], cd3, W4))                   # (H8, P*W8)
        e2 = round_u8(col_pass(t2[H8:], cu2, W4))                   # (H2, P*W2)
        lap_write(l2_ref, g1, e2)

        # pyrUp from the coarsest level.
        t3 = jnp.dot(r3[...], g3, preferred_element_type=f32)       # (H4, P*W8)
        e3 = round_u8(col_pass(t3, cu3, W8))                        # (H4, P*W4)
        lap_write(l3_ref, g2, e3)

        l4_ref[0] = (g3.astype(f32) * inv255).astype(l4_ref.dtype)

    return kernel


def _build_operators(H, W):
    """bf16 operator constants: 4 (stacked) row ops + 6 shared column ops."""
    H2, H4, H8 = H // 2, H // 4, H // 8
    W2, W4, W8 = W // 2, W // 4, W // 8
    d1r, d2r, d3r = pyr_down_matrix(H), pyr_down_matrix(H2), pyr_down_matrix(H4)
    u1r, u2r, u3r = pyr_up_matrix(H2), pyr_up_matrix(H4), pyr_up_matrix(H8)
    row_ops = [d1r,
               np.concatenate([d2r, u1r], axis=0),   # shared RHS g1
               np.concatenate([d3r, u2r], axis=0),   # shared RHS g2
               u3r]
    col_ops = [pyr_down_matrix(W).T, pyr_down_matrix(W2).T, pyr_down_matrix(W4).T,
               pyr_up_matrix(W2).T, pyr_up_matrix(W4).T, pyr_up_matrix(W8).T]
    # Entries are multiples of 1/16 (down) or 1/8 (up) -> bf16-exact.
    to_bf16 = lambda m: jnp.asarray(m, dtype=jnp.bfloat16)
    return [to_bf16(m) for m in row_ops], [to_bf16(m) for m in col_ops]


def _tpu_vmem_limit_and_cores():
    """(scoped vmem limit bytes, multi_tensorcore) derived from the device."""
    kind = ""
    try:
        kind = (jax.devices()[0].device_kind or "").lower()
    except Exception:
        pass
    is_v7 = ("v7" in kind) or ("7x" in kind)
    multi_core = is_v7 or ("v4" in kind) or ("v3" in kind)
    vmem_phys = None
    try:
        info = pltpu.get_tpu_info()
        vmem_phys = int(getattr(info, "vmem_capacity_bytes", 0)) or None
    except Exception:
        vmem_phys = None
    if vmem_phys is None:
        vmem_phys = (64 << 20) if is_v7 else (128 << 20)
    limit = max(32 << 20, min(vmem_phys - (8 << 20), 100 << 20))
    if is_v7:
        limit = min(limit, 56 << 20)   # 64 MiB / TensorCore on v7x
    return limit, multi_core


def _choose_plane_tile(bc, H, W, vmem_budget_bytes, multi_core):
    """Number of image planes folded into the lane axis per grid step."""
    W8 = max(1, W // 8)
    hw = H * W
    # Per-plane VMEM: double-buffered f32 input slab + 4 double-buffered f32
    # output slabs + live bf16/f32 intermediates (g0..g3, e1..e3, t, hi/lo).
    per_plane = (2 * 4 * hw
                 + 2 * 4 * (hw + hw // 4 + hw // 16 + hw // 64)
                 + 14 * hw)
    cap = max(1, int(vmem_budget_bytes // per_plane))
    cap = min(cap, 128)
    p = min(cap, bc)
    # Planes needed so the narrowest output (width W8) stores >= 128 lanes.
    p_dense = -(-128 // W8)
    if multi_core and bc > 1:
        half = -(-bc // 2)             # >= 2 grid steps so both TCs get work,
        if half >= p_dense:            # but never at the cost of lane density.
            p = min(p, half)
    p = max(p, min(p_dense, cap, bc))  # lane-dense lower bound when bc allows
    return max(1, p)


def laplacian_pyramid(batch, levels=4):
    """JAX/Pallas equivalent of LaplacianPyramid(levels).forward(batch)."""
    assert levels >= 4, "the torch module indexes gp[3]; needs levels >= 4"
    # TODO(synk): the torch module converts each patch to RGB via PIL; feed
    # 3-channel input here (grayscale->RGB replication is not performed).
    if batch.ndim == 3:
        batch = batch[None, :, :, :]
    B, C, H, W = batch.shape
    assert H % 8 == 0 and W % 8 == 0, "need 3 clean pyrDown halvings"
    BC = B * C
    H2, H4, H8 = H // 2, H // 4, H // 8
    W2, W4, W8 = W // 2, W // 4, W // 8

    row_ops, col_ops = _build_operators(H, W)
    op_bytes = 2 * 2 * sum(int(np.prod(m.shape)) for m in row_ops + col_ops)

    vmem_limit, multi_core = _tpu_vmem_limit_and_cores()
    budget = max(1 << 20, int(0.70 * vmem_limit) - op_bytes)
    P = _choose_plane_tile(BC, H, W, budget, multi_core)
    nb = pl.cdiv(BC, P)
    BCp = nb * P

    x = batch.reshape(BC, H, W).astype(jnp.float32)
    if BCp != BC:
        x = jnp.pad(x, ((0, BCp - BC), (0, 0), (0, 0)))
    # Fold P planes into the lane axis (layout plumbing in the wrapper).
    xf = x.reshape(nb, P, H, W).transpose(0, 2, 1, 3).reshape(nb, H, P * W)

    kernel = _make_kernel(P, H, W)

    plane_spec = lambda h, w: pl.BlockSpec((1, h, P * w), lambda i: (i, 0, 0))
    # Constant operators (a few KB total now): constant index_map, fetched once.
    const_spec = lambda m: pl.BlockSpec(m.shape, lambda i: (0, 0))

    l1, l2, l3, l4 = pl.pallas_call(
        kernel,
        grid=(nb,),
        in_specs=[plane_spec(H, W)] + [const_spec(m) for m in row_ops + col_ops],
        out_specs=[plane_spec(H, W), plane_spec(H2, W2),
                   plane_spec(H4, W4), plane_spec(H8, W8)],
        out_shape=(
            jax.ShapeDtypeStruct((nb, H, P * W), jnp.float32),
            jax.ShapeDtypeStruct((nb, H2, P * W2), jnp.float32),
            jax.ShapeDtypeStruct((nb, H4, P * W4), jnp.float32),
            jax.ShapeDtypeStruct((nb, H8, P * W8), jnp.float32),
        ),
        compiler_params=pltpu.CompilerParams(
            dimension_semantics=("parallel",),
            vmem_limit_bytes=int(vmem_limit)),
    )(xf, *row_ops, *col_ops)

    def unfold(y, hk, wk):
        y = y.reshape(nb, hk, P, wk).transpose(0, 2, 1, 3)
        return y.reshape(BCp, hk, wk)[:BC].reshape(B, C, hk, wk)

    return {
        "level1": unfold(l1, H, W),
        "level2": unfold(l2, H2, W2),
        "level3": unfold(l3, H4, W4),
        "level4": unfold(l4, H8, W8),
    }


def _reference(batch):
    """Pure NumPy reference (same operator matrices, f64 accumulation)."""
    batch = np.asarray(batch, dtype=np.float32)
    B, C, H, W = batch.shape
    g = batch.reshape(B * C, H, W)
    g0 = np.clip(np.floor(g * np.float32(255.0)), 0.0, 255.0).astype(np.float64)

    rnd = lambda v: np.clip(np.floor(v + 0.5), 0.0, 255.0)
    sep = lambda R, x, Ct: np.einsum('rh,phw,wc->prc', R, x, Ct)
    down = lambda x, h, w: rnd(sep(pyr_down_matrix(h), x, pyr_down_matrix(w).T))
    up = lambda x, h, w: rnd(sep(pyr_up_matrix(h), x, pyr_up_matrix(w).T))

    g1 = down(g0, H, W)
    g2 = down(g1, H // 2, W // 2)
    g3 = down(g2, H // 4, W // 4)
    e1 = up(g1, H // 2, W // 2)
    e2 = up(g2, H // 4, W // 4)
    e3 = up(g3, H // 8, W // 8)

    lap = lambda a, b: np.clip(a - b, 0.0, 255.0) / 255.0
    shp = lambda a, f: a.reshape(B, C, H // f, W // f).astype(np.float32)
    return {
        "level1": shp(lap(g0, e1), 1),
        "level2": shp(lap(g1, e2), 2),
        "level3": shp(lap(g2, e3), 4),
        "level4": shp(g3 / 255.0, 8),
    }


if __name__ == "__main__":
    key = jax.random.PRNGKey(0)
    # 3 channels: the torch module converts every patch to RGB before cv2.
    x = jax.random.uniform(key, (2, 3, 16, 16), dtype=jnp.float32)

    pyr = laplacian_pyramid(x, levels=4)
    jax.block_until_ready(pyr)

    assert pyr["level1"].shape == (2, 3, 16, 16)
    assert pyr["level2"].shape == (2, 3, 8, 8)
    assert pyr["level3"].shape == (2, 3, 4, 4)
    assert pyr["level4"].shape == (2, 3, 2, 2)
    assert all(v.dtype == jnp.float32 for v in pyr.values())

    ref = _reference(np.asarray(x))
    for k in ("level1", "level2", "level3", "level4"):
        err = float(jnp.max(jnp.abs(pyr[k] - jnp.asarray(ref[k]))))
        # tolerate +-1 uint8 LSB at exact rounding boundaries; catches any
        # layout / operator / folding bug (those are >> 1 LSB).
        assert err <= 2.0 / 255.0 + 1e-6, (k, err)

    print("KERNEL_OK")
</pallas_src>

<mosaic_0001>
module attributes {stable_mosaic.version = 11 : i64} {
  func.func @kernel(%arg0: i32, %arg1: memref<1x16x96xf32, #tpu.memory_space<vmem>>, %arg2: memref<8x16xbf16, #tpu.memory_space<vmem>>, %arg3: memref<20x8xbf16, #tpu.memory_space<vmem>>, %arg4: memref<10x4xbf16, #tpu.memory_space<vmem>>, %arg5: memref<4x2xbf16, #tpu.memory_space<vmem>>, %arg6: memref<16x8xbf16, #tpu.memory_space<vmem>>, %arg7: memref<8x4xbf16, #tpu.memory_space<vmem>>, %arg8: memref<4x2xbf16, #tpu.memory_space<vmem>>, %arg9: memref<8x16xbf16, #tpu.memory_space<vmem>>, %arg10: memref<4x8xbf16, #tpu.memory_space<vmem>>, %arg11: memref<2x4xbf16, #tpu.memory_space<vmem>>, %arg12: memref<1x16x96xf32, #tpu.memory_space<vmem>>, %arg13: memref<1x8x48xf32, #tpu.memory_space<vmem>>, %arg14: memref<1x4x24xf32, #tpu.memory_space<vmem>>, %arg15: memref<1x2x12xf32, #tpu.memory_space<vmem>>) attributes {dimension_semantics = [#tpu.dimension_semantics<parallel>], iteration_bounds = array<i64: 1>, scalar_prefetch = 0 : i64, scratch_operands = 0 : i64, tpu.core_type = #tpu.core_type<tc>, window_params = [{transform_indices = @transform_0, window_bounds = array<i64: 1, 16, 96>}, {pipeline_mode = #tpu.pipeline_mode<synchronous>, transform_indices = @transform_1, window_bounds = array<i64: 8, 16>}, {pipeline_mode = #tpu.pipeline_mode<synchronous>, transform_indices = @transform_2, window_bounds = array<i64: 20, 8>}, {pipeline_mode = #tpu.pipeline_mode<synchronous>, transform_indices = @transform_3, window_bounds = array<i64: 10, 4>}, {pipeline_mode = #tpu.pipeline_mode<synchronous>, transform_indices = @transform_4, window_bounds = array<i64: 4, 2>}, {pipeline_mode = #tpu.pipeline_mode<synchronous>, transform_indices = @transform_5, window_bounds = array<i64: 16, 8>}, {pipeline_mode = #tpu.pipeline_mode<synchronous>, transform_indices = @transform_6, window_bounds = array<i64: 8, 4>}, {pipeline_mode = #tpu.pipeline_mode<synchronous>, transform_indices = @transform_7, window_bounds = array<i64: 4, 2>}, {pipeline_mode = #tpu.pipeline_mode<synchronous>, transform_indices = @transform_8, window_bounds = array<i64: 8, 16>}, {pipeline_mode = #tpu.pipeline_mode<synchronous>, transform_indices = @transform_9, window_bounds = array<i64: 4, 8>}, {pipeline_mode = #tpu.pipeline_mode<synchronous>, transform_indices = @transform_10, window_bounds = array<i64: 2, 4>}, {transform_indices = @transform_11, window_bounds = array<i64: 1, 16, 96>}, {transform_indices = @transform_12, window_bounds = array<i64: 1, 8, 48>}, {transform_indices = @transform_13, window_bounds = array<i64: 1, 4, 24>}, {transform_indices = @transform_14, window_bounds = array<i64: 1, 2, 12>}]} {
    %c0 = arith.constant 0 : index
    %c0_0 = arith.constant 0 : index
    %c0_1 = arith.constant 0 : index
    %0 = vector.load %arg1[%c0, %c0_0, %c0_1] : memref<1x16x96xf32, #tpu.memory_space<vmem>>, vector<1x16x96xf32>
    %1 = vector.shape_cast %0 : vector<1x16x96xf32> to vector<16x96xf32>
    %cst = arith.constant 2.550000e+02 : f32
    %2 = vector.broadcast %cst : f32 to vector<16x96xf32>
    %3 = arith.mulf %1, %2 : vector<16x96xf32>
    %4 = math.floor %3 : vector<16x96xf32>
    %cst_2 = arith.constant 0.000000e+00 : f32
    %cst_3 = arith.constant 2.550000e+02 : f32
    %5 = vector.broadcast %cst_2 : f32 to vector<16x96xf32>
    %6 = arith.maximumf %5, %4 : vector<16x96xf32>
    %7 = vector.broadcast %cst_3 : f32 to vector<16x96xf32>
    %8 = arith.minimumf %7, %6 : vector<16x96xf32>
    %9 = arith.truncf %8 : vector<16x96xf32> to vector<16x96xbf16>
    %c0_4 = arith.constant 0 : index
    %c0_5 = arith.constant 0 : index
    %10 = vector.load %arg2[%c0_4, %c0_5] : memref<8x16xbf16, #tpu.memory_space<vmem>>, vector<8x16xbf16>
    %cst_6 = arith.constant dense<0.000000e+00> : vector<8x96xf32>
    %11 = tpu.matmul %10, %9, %cst_6 {dimension_numbers = #tpu.dot_dimension_numbers<[1], [0], [0], [1], [0, 0, 1, 1], [], []>} : vector<8x16xbf16>, vector<16x96xbf16>, vector<8x96xf32> -> vector<8x96xf32>
    %c0_7 = arith.constant 0 : index
    %c0_8 = arith.constant 0 : index
    %12 = vector.load %arg6[%c0_7, %c0_8] : memref<16x8xbf16, #tpu.memory_space<vmem>>, vector<16x8xbf16>
    %13 = arith.truncf %11 : vector<8x96xf32> to vector<8x96xbf16>
    %14 = arith.extf %13 : vector<8x96xbf16> to vector<8x96xf32>
    %15 = arith.subf %11, %14 : vector<8x96xf32>
    %16 = arith.truncf %15 : vector<8x96xf32> to vector<8x96xbf16>
    %17 = vector.extract_strided_slice %13 {offsets = [0, 0], sizes = [8, 16], strides = [1, 1]} : vector<8x96xbf16> to vector<8x16xbf16>
    %18 = vector.extract_strided_slice %16 {offsets = [0, 0], sizes = [8, 16], strides = [1, 1]} : vector<8x96xbf16> to vector<8x16xbf16>
    %cst_9 = arith.constant dense<0.000000e+00> : vector<8x8xf32>
    %19 = tpu.matmul %17, %12, %cst_9 {dimension_numbers = #tpu.dot_dimension_numbers<[1], [0], [0], [1], [0, 0, 1, 1], [], []>} : vector<8x16xbf16>, vector<16x8xbf16>, vector<8x8xf32> -> vector<8x8xf32>
    %cst_10 = arith.constant dense<0.000000e+00> : vector<8x8xf32>
    %20 = tpu.matmul %18, %12, %cst_10 {dimension_numbers = #tpu.dot_dimension_numbers<[1], [0], [0], [1], [0, 0, 1, 1], [], []>} : vector<8x16xbf16>, vector<16x8xbf16>, vector<8x8xf32> -> vector<8x8xf32>
    %21 = arith.addf %19, %20 : vector<8x8xf32>
    %22 = vector.extract_strided_slice %13 {offsets = [0, 16], sizes = [8, 16], strides = [1, 1]} : vector<8x96xbf16> to vector<8x16xbf16>
    %23 = vector.extract_strided_slice %16 {offsets = [0, 16], sizes = [8, 16], strides = [1, 1]} : vector<8x96xbf16> to vector<8x16xbf16>
    %cst_11 = arith.constant dense<0.000000e+00> : vector<8x8xf32>
    %24 = tpu.matmul %22, %12, %cst_11 {dimension_numbers = #tpu.dot_dimension_numbers<[1], [0], [0], [1], [0, 0, 1, 1], [], []>} : vector<8x16xbf16>, vector<16x8xbf16>, vector<8x8xf32> -> vector<8x8xf32>
    %cst_12 = arith.constant dense<0.000000e+00> : vector<8x8xf32>
    %25 = tpu.matmul %23, %12, %cst_12 {dimension_numbers = #tpu.dot_dimension_numbers<[1], [0], [0], [1], [0, 0, 1, 1], [], []>} : vector<8x16xbf16>, vector<16x8xbf16>, vector<8x8xf32> -> vector<8x8xf32>
    %26 = arith.addf %24, %25 : vector<8x8xf32>
    %27 = vector.extract_strided_slice %13 {offsets = [0, 32], sizes = [8, 16], strides = [1, 1]} : vector<8x96xbf16> to vector<8x16xbf16>
    %28 = vector.extract_strided_slice %16 {offsets = [0, 32], sizes = [8, 16], strides = [1, 1]} : vector<8x96xbf16> to vector<8x16xbf16>
    %cst_13 = arith.constant dense<0.000000e+00> : vector<8x8xf32>
    %29 = tpu.matmul %27, %12, %cst_13 {dimension_numbers = #tpu.dot_dimension_numbers<[1], [0], [0], [1], [0, 0, 1, 1], [], []>} : vector<8x16xbf16>, vector<16x8xbf16>, vector<8x8xf32> -> vector<8x8xf32>
    %cst_14 = arith.constant dense<0.000000e+00> : vector<8x8xf32>
    %30 = tpu.matmul %28, %12, %cst_14 {dimension_numbers = #tpu.dot_dimension_numbers<[1], [0], [0], [1], [0, 0, 1, 1], [], []>} : vector<8x16xbf16>, vector<16x8xbf16>, vector<8x8xf32> -> vector<8x8xf32>
    %31 = arith.addf %29, %30 : vector<8x8xf32>
    %32 = vector.extract_strided_slice %13 {offsets = [0, 48], sizes = [8, 16], strides = [1, 1]} : vector<8x96xbf16> to vector<8x16xbf16>
    %33 = vector.extract_strided_slice %16 {offsets = [0, 48], sizes = [8, 16], strides = [1, 1]} : vector<8x96xbf16> to vector<8x16xbf16>
    %cst_15 = arith.constant dense<0.000000e+00> : vector<8x8xf32>
    %34 = tpu.matmul %32, %12, %cst_15 {dimension_numbers = #tpu.dot_dimension_numbers<[1], [0], [0], [1], [0, 0, 1, 1], [], []>} : vector<8x16xbf16>, vector<16x8xbf16>, vector<8x8xf32> -> vector<8x8xf32>
    %cst_16 = arith.constant dense<0.000000e+00> : vector<8x8xf32>
    %35 = tpu.matmul %33, %12, %cst_16 {dimension_numbers = #tpu.dot_dimension_numbers<[1], [0], [0], [1], [0, 0, 1, 1], [], []>} : vector<8x16xbf16>, vector<16x8xbf16>, vector<8x8xf32> -> vector<8x8xf32>
    %36 = arith.addf %34, %35 : vector<8x8xf32>
    %37 = vector.extract_strided_slice %13 {offsets = [0, 64], sizes = [8, 16], strides = [1, 1]} : vector<8x96xbf16> to vector<8x16xbf16>
    %38 = vector.extract_strided_slice %16 {offsets = [0, 64], sizes = [8, 16], strides = [1, 1]} : vector<8x96xbf16> to vector<8x16xbf16>
    %cst_17 = arith.constant dense<0.000000e+00> : vector<8x8xf32>
    %39 = tpu.matmul %37, %12, %cst_17 {dimension_numbers = #tpu.dot_dimension_numbers<[1], [0], [0], [1], [0, 0, 1, 1], [], []>} : vector<8x16xbf16>, vector<16x8xbf16>, vector<8x8xf32> -> vector<8x8xf32>
    %cst_18 = arith.constant dense<0.000000e+00> : vector<8x8xf32>
    %40 = tpu.matmul %38, %12, %cst_18 {dimension_numbers = #tpu.dot_dimension_numbers<[1], [0], [0], [1], [0, 0, 1, 1], [], []>} : vector<8x16xbf16>, vector<16x8xbf16>, vector<8x8xf32> -> vector<8x8xf32>
    %41 = arith.addf %39, %40 : vector<8x8xf32>
    %42 = vector.extract_strided_slice %13 {offsets = [0, 80], sizes = [8, 16], strides = [1, 1]} : vector<8x96xbf16> to vector<8x16xbf16>
    %43 = vector.extract_strided_slice %16 {offsets = [0, 80], sizes = [8, 16], strides = [1, 1]} : vector<8x96xbf16> to vector<8x16xbf16>
    %cst_19 = arith.constant dense<0.000000e+00> : vector<8x8xf32>
    %44 = tpu.matmul %42, %12, %cst_19 {dimension_numbers = #tpu.dot_dimension_numbers<[1], [0], [0], [1], [0, 0, 1, 1], [], []>} : vector<8x16xbf16>, vector<16x8xbf16>, vector<8x8xf32> -> vector<8x8xf32>
    %cst_20 = arith.constant dense<0.000000e+00> : vector<8x8xf32>
    %45 = tpu.matmul %43, %12, %cst_20 {dimension_numbers = #tpu.dot_dimension_numbers<[1], [0], [0], [1], [0, 0, 1, 1], [], []>} : vector<8x16xbf16>, vector<16x8xbf16>, vector<8x8xf32> -> vector<8x8xf32>
    %46 = arith.addf %44, %45 : vector<8x8xf32>
    %47 = tpu.concatenate %21, %26, %31, %36, %41, %46 in 1 : vector<8x8xf32>, vector<8x8xf32>, vector<8x8xf32>, vector<8x8xf32>, vector<8x8xf32>, vector<8x8xf32> -> vector<8x48xf32>
    %cst_21 = arith.constant 5.000000e-01 : f32
    %48 = vector.broadcast %cst_21 : f32 to vector<8x48xf32>
    %49 = arith.addf %47, %48 : vector<8x48xf32>
    %50 = math.floor %49 : vector<8x48xf32>
    %cst_22 = arith.constant 0.000000e+00 : f32
    %cst_23 = arith.constant 2.550000e+02 : f32
    %51 = vector.broadcast %cst_22 : f32 to vector<8x48xf32>
    %52 = arith.maximumf %51, %50 : vector<8x48xf32>
    %53 = vector.broadcast %cst_23 : f32 to vector<8x48xf32>
    %54 = arith.minimumf %53, %52 : vector<8x48xf32>
    %55 = arith.truncf %54 : vector<8x48xf32> to vector<8x48xbf16>
    %c0_24 = arith.constant 0 : index
    %c0_25 = arith.constant 0 : index
    %56 = vector.load %arg3[%c0_24, %c0_25] : memref<20x8xbf16, #tpu.memory_space<vmem>>, vector<20x8xbf16>
    %cst_26 = arith.constant dense<0.000000e+00> : vector<20x48xf32>
    %57 = tpu.matmul %56, %55, %cst_26 {dimension_numbers = #tpu.dot_dimension_numbers<[1], [0], [0], [1], [0, 0, 1, 1], [], []>} : vector<20x8xbf16>, vector<8x48xbf16>, vector<20x48xf32> -> vector<20x48xf32>
    %58 = vector.extract_strided_slice %57 {offsets = [0, 0], sizes = [4, 48], strides = [1, 1]} : vector<20x48xf32> to vector<4x48xf32>
    %c0_27 = arith.constant 0 : index
    %c0_28 = arith.constant 0 : index
    %59 = vector.load %arg7[%c0_27, %c0_28] : memref<8x4xbf16, #tpu.memory_space<vmem>>, vector<8x4xbf16>
    %60 = arith.truncf %58 : vector<4x48xf32> to vector<4x48xbf16>
    %61 = arith.extf %60 : vector<4x48xbf16> to vector<4x48xf32>
    %62 = arith.subf %58, %61 : vector<4x48xf32>
    %63 = arith.truncf %62 : vector<4x48xf32> to vector<4x48xbf16>
    %64 = vector.extract_strided_slice %60 {offsets = [0, 0], sizes = [4, 8], strides = [1, 1]} : vector<4x48xbf16> to vector<4x8xbf16>
    %65 = vector.extract_strided_slice %63 {offsets = [0, 0], sizes = [4, 8], strides = [1, 1]} : vector<4x48xbf16> to vector<4x8xbf16>
    %cst_29 = arith.constant dense<0.000000e+00> : vector<4x4xf32>
    %66 = tpu.matmul %64, %59, %cst_29 {dimension_numbers = #tpu.dot_dimension_numbers<[1], [0], [0], [1], [0, 0, 1, 1], [], []>} : vector<4x8xbf16>, vector<8x4xbf16>, vector<4x4xf32> -> vector<4x4xf32>
    %cst_30 = arith.constant dense<0.000000e+00> : vector<4x4xf32>
    %67 = tpu.matmul %65, %59, %cst_30 {dimension_numbers = #tpu.dot_dimension_numbers<[1], [0], [0], [1], [0, 0, 1, 1], [], []>} : vector<4x8xbf16>, vector<8x4xbf16>, vector<4x4xf32> -> vector<4x4xf32>
    %68 = arith.addf %66, %67 : vector<4x4xf32>
    %69 = vector.extract_strided_slice %60 {offsets = [0, 8], sizes = [4, 8], strides = [1, 1]} : vector<4x48xbf16> to vector<4x8xbf16>
    %70 = vector.extract_strided_slice %63 {offsets = [0, 8], sizes = [4, 8], strides = [1, 1]} : vector<4x48xbf16> to vector<4x8xbf16>
    %cst_31 = arith.constant dense<0.000000e+00> : vector<4x4xf32>
    %71 = tpu.matmul %69, %59, %cst_31 {dimension_numbers = #tpu.dot_dimension_numbers<[1], [0], [0], [1], [0, 0, 1, 1], [], []>} : vector<4x8xbf16>, vector<8x4xbf16>, vector<4x4xf32> -> vector<4x4xf32>
    %cst_32 = arith.constant dense<0.000000e+00> : vector<4x4xf32>
    %72 = tpu.matmul %70, %59, %cst_32 {dimension_numbers = #tpu.dot_dimension_numbers<[1], [0], [0], [1], [0, 0, 1, 1], [], []>} : vector<4x8xbf16>, vector<8x4xbf16>, vector<4x4xf32> -> vector<4x4xf32>
    %73 = arith.addf %71, %72 : vector<4x4xf32>
    %74 = vector.extract_strided_slice %60 {offsets = [0, 16], sizes = [4, 8], strides = [1, 1]} : vector<4x48xbf16> to vector<4x8xbf16>
    %75 = vector.extract_strided_slice %63 {offsets = [0, 16], sizes = [4, 8], strides = [1, 1]} : vector<4x48xbf16> to vector<4x8xbf16>
    %cst_33 = arith.constant dense<0.000000e+00> : vector<4x4xf32>
    %76 = tpu.matmul %74, %59, %cst_33 {dimension_numbers = #tpu.dot_dimension_numbers<[1], [0], [0], [1], [0, 0, 1, 1], [], []>} : vector<4x8xbf16>, vector<8x4xbf16>, vector<4x4xf32> -> vector<4x4xf32>
    %cst_34 = arith.constant dense<0.000000e+00> : vector<4x4xf32>
    %77 = tpu.matmul %75, %59, %cst_34 {dimension_numbers = #tpu.dot_dimension_numbers<[1], [0], [0], [1], [0, 0, 1, 1], [], []>} : vector<4x8xbf16>, vector<8x4xbf16>, vector<4x4xf32> -> vector<4x4xf32>
    %78 = arith.addf %76, %77 : vector<4x4xf32>
    %79 = vector.extract_strided_slice %60 {offsets = [0, 24], sizes = [4, 8], strides = [1, 1]} : vector<4x48xbf16> to vector<4x8xbf16>
    %80 = vector.extract_strided_slice %63 {offsets = [0, 24], sizes = [4, 8], strides = [1, 1]} : vector<4x48xbf16> to vector<4x8xbf16>
    %cst_35 = arith.constant dense<0.000000e+00> : vector<4x4xf32>
    %81 = tpu.matmul %79, %59, %cst_35 {dimension_numbers = #tpu.dot_dimension_numbers<[1], [0], [0], [1], [0, 0, 1, 1], [], []>} : vector<4x8xbf16>, vector<8x4xbf16>, vector<4x4xf32> -> vector<4x4xf32>
    %cst_36 = arith.constant dense<0.000000e+00> : vector<4x4xf32>
    %82 = tpu.matmul %80, %59, %cst_36 {dimension_numbers = #tpu.dot_dimension_numbers<[1], [0], [0], [1], [0, 0, 1, 1], [], []>} : vector<4x8xbf16>, vector<8x4xbf16>, vector<4x4xf32> -> vector<4x4xf32>
    %83 = arith.addf %81, %82 : vector<4x4xf32>
    %84 = vector.extract_strided_slice %60 {offsets = [0, 32], sizes = [4, 8], strides = [1, 1]} : vector<4x48xbf16> to vector<4x8xbf16>
    %85 = vector.extract_strided_slice %63 {offsets = [0, 32], sizes = [4, 8], strides = [1, 1]} : vector<4x48xbf16> to vector<4x8xbf16>
    %cst_37 = arith.constant dense<0.000000e+00> : vector<4x4xf32>
    %86 = tpu.matmul %84, %59, %cst_37 {dimension_numbers = #tpu.dot_dimension_numbers<[1], [0], [0], [1], [0, 0, 1, 1], [], []>} : vector<4x8xbf16>, vector<8x4xbf16>, vector<4x4xf32> -> vector<4x4xf32>
    %cst_38 = arith.constant dense<0.000000e+00> : vector<4x4xf32>
    %87 = tpu.matmul %85, %59, %cst_38 {dimension_numbers = #tpu.dot_dimension_numbers<[1], [0], [0], [1], [0, 0, 1, 1], [], []>} : vector<4x8xbf16>, vector<8x4xbf16>, vector<4x4xf32> -> vector<4x4xf32>
    %88 = arith.addf %86, %87 : vector<4x4xf32>
    %89 = vector.extract_strided_slice %60 {offsets = [0, 40], sizes = [4, 8], strides = [1, 1]} : vector<4x48xbf16> to vector<4x8xbf16>
    %90 = vector.extract_strided_slice %63 {offsets = [0, 40], sizes = [4, 8], strides = [1, 1]} : vector<4x48xbf16> to vector<4x8xbf16>
    %cst_39 = arith.constant dense<0.000000e+00> : vector<4x4xf32>
    %91 = tpu.matmul %89, %59, %cst_39 {dimension_numbers = #tpu.dot_dimension_numbers<[1], [0], [0], [1], [0, 0, 1, 1], [], []>} : vector<4x8xbf16>, vector<8x4xbf16>, vector<4x4xf32> -> vector<4x4xf32>
    %cst_40 = arith.constant dense<0.000000e+00> : vector<4x4xf32>
    %92 = tpu.matmul %90, %59, %cst_40 {dimension_numbers = #tpu.dot_dimension_numbers<[1], [0], [0], [1], [0, 0, 1, 1], [], []>} : vector<4x8xbf16>, vector<8x4xbf16>, vector<4x4xf32> -> vector<4x4xf32>
    %93 = arith.addf %91, %92 : vector<4x4xf32>
    %94 = tpu.concatenate %68, %73, %78, %83, %88, %93 in 1 : vector<4x4xf32>, vector<4x4xf32>, vector<4x4xf32>, vector<4x4xf32>, vector<4x4xf32>, vector<4x4xf32> -> vector<4x24xf32>
    %cst_41 = arith.constant 5.000000e-01 : f32
    %95 = vector.broadcast %cst_41 : f32 to vector<4x24xf32>
    %96 = arith.addf %94, %95 : vector<4x24xf32>
    %97 = math.floor %96 : vector<4x24xf32>
    %cst_42 = arith.constant 0.000000e+00 : f32
    %cst_43 = arith.constant 2.550000e+02 : f32
    %98 = vector.broadcast %cst_42 : f32 to vector<4x24xf32>
    %99 = arith.maximumf %98, %97 : vector<4x24xf32>
    %100 = vector.broadcast %cst_43 : f32 to vector<4x24xf32>
    %101 = arith.minimumf %100, %99 : vector<4x24xf32>
    %102 = arith.truncf %101 : vector<4x24xf32> to vector<4x24xbf16>
    %103 = vector.extract_strided_slice %57 {offsets = [4, 0], sizes = [16, 48], strides = [1, 1]} : vector<20x48xf32> to vector<16x48xf32>
    %c0_44 = arith.constant 0 : index
    %c0_45 = arith.constant 0 : index
    %104 = vector.load %arg9[%c0_44, %c0_45] : memref<8x16xbf16, #tpu.memory_space<vmem>>, vector<8x16xbf16>
    %105 = arith.truncf %103 : vector<16x48xf32> to vector<16x48xbf16>
    %106 = arith.extf %105 : vector<16x48xbf16> to vector<16x48xf32>
    %107 = arith.subf %103, %106 : vector<16x48xf32>
    %108 = arith.truncf %107 : vector<16x48xf32> to vector<16x48xbf16>
    %109 = vector.extract_strided_slice %105 {offsets = [0, 0], sizes = [16, 8], strides = [1, 1]} : vector<16x48xbf16> to vector<16x8xbf16>
    %110 = vector.extract_strided_slice %108 {offsets = [0, 0], sizes = [16, 8], strides = [1, 1]} : vector<16x48xbf16> to vector<16x8xbf16>
    %cst_46 = arith.constant dense<0.000000e+00> : vector<16x16xf32>
    %111 = tpu.matmul %109, %104, %cst_46 {dimension_numbers = #tpu.dot_dimension_numbers<[1], [0], [0], [1], [0, 0, 1, 1], [], []>} : vector<16x8xbf16>, vector<8x16xbf16>, vector<16x16xf32> -> vector<16x16xf32>
    %cst_47 = arith.constant dense<0.000000e+00> : vector<16x16xf32>
    %112 = tpu.matmul %110, %104, %cst_47 {dimension_numbers = #tpu.dot_dimension_numbers<[1], [0], [0], [1], [0, 0, 1, 1], [], []>} : vector<16x8xbf16>, vector<8x16xbf16>, vector<16x16xf32> -> vector<16x16xf32>
    %113 = arith.addf %111, %112 : vector<16x16xf32>
    %114 = vector.extract_strided_slice %105 {offsets = [0, 8], sizes = [16, 8], strides = [1, 1]} : vector<16x48xbf16> to vector<16x8xbf16>
    %115 = vector.extract_strided_slice %108 {offsets = [0, 8], sizes = [16, 8], strides = [1, 1]} : vector<16x48xbf16> to vector<16x8xbf16>
    %cst_48 = arith.constant dense<0.000000e+00> : vector<16x16xf32>
    %116 = tpu.matmul %114, %104, %cst_48 {dimension_numbers = #tpu.dot_dimension_numbers<[1], [0], [0], [1], [0, 0, 1, 1], [], []>} : vector<16x8xbf16>, vector<8x16xbf16>, vector<16x16xf32> -> vector<16x16xf32>
    %cst_49 = arith.constant dense<0.000000e+00> : vector<16x16xf32>
    %117 = tpu.matmul %115, %104, %cst_49 {dimension_numbers = #tpu.dot_dimension_numbers<[1], [0], [0], [1], [0, 0, 1, 1], [], []>} : vector<16x8xbf16>, vector<8x16xbf16>, vector<16x16xf32> -> vector<16x16xf32>
    %118 = arith.addf %116, %117 : vector<16x16xf32>
    %119 = vector.extract_strided_slice %105 {offsets = [0, 16], sizes = [16, 8], strides = [1, 1]} : vector<16x48xbf16> to vector<16x8xbf16>
    %120 = vector.extract_strided_slice %108 {offsets = [0, 16], sizes = [16, 8], strides = [1, 1]} : vector<16x48xbf16> to vector<16x8xbf16>
    %cst_50 = arith.constant dense<0.000000e+00> : vector<16x16xf32>
    %121 = tpu.matmul %119, %104, %cst_50 {dimension_numbers = #tpu.dot_dimension_numbers<[1], [0], [0], [1], [0, 0, 1, 1], [], []>} : vector<16x8xbf16>, vector<8x16xbf16>, vector<16x16xf32> -> vector<16x16xf32>
    %cst_51 = arith.constant dense<0.000000e+00> : vector<16x16xf32>
    %122 = tpu.matmul %120, %104, %cst_51 {dimension_numbers = #tpu.dot_dimension_numbers<[1], [0], [0], [1], [0, 0, 1, 1], [], []>} : vector<16x8xbf16>, vector<8x16xbf16>, vector<16x16xf32> -> vector<16x16xf32>
    %123 = arith.addf %121, %122 : vector<16x16xf32>
    %124 = vector.extract_strided_slice %105 {offsets = [0, 24], sizes = [16, 8], strides = [1, 1]} : vector<16x48xbf16> to vector<16x8xbf16>
    %125 = vector.extract_strided_slice %108 {offsets = [0, 24], sizes = [16, 8], strides = [1, 1]} : vector<16x48xbf16> to vector<16x8xbf16>
    %cst_52 = arith.constant dense<0.000000e+00> : vector<16x16xf32>
    %126 = tpu.matmul %124, %104, %cst_52 {dimension_numbers = #tpu.dot_dimension_numbers<[1], [0], [0], [1], [0, 0, 1, 1], [], []>} : vector<16x8xbf16>, vector<8x16xbf16>, vector<16x16xf32> -> vector<16x16xf32>
    %cst_53 = arith.constant dense<0.000000e+00> : vector<16x16xf32>
    %127 = tpu.matmul %125, %104, %cst_53 {dimension_numbers = #tpu.dot_dimension_numbers<[1], [0], [0], [1], [0, 0, 1, 1], [], []>} : vector<16x8xbf16>, vector<8x16xbf16>, vector<16x16xf32> -> vector<16x16xf32>
    %128 = arith.addf %126, %127 : vector<16x16xf32>
    %129 = vector.extract_strided_slice %105 {offsets = [0, 32], sizes = [16, 8], strides = [1, 1]} : vector<16x48xbf16> to vector<16x8xbf16>
    %130 = vector.extract_strided_slice %108 {offsets = [0, 32], sizes = [16, 8], strides = [1, 1]} : vector<16x48xbf16> to vector<16x8xbf16>
    %cst_54 = arith.constant dense<0.000000e+00> : vector<16x16xf32>
    %131 = tpu.matmul %129, %104, %cst_54 {dimension_numbers = #tpu.dot_dimension_numbers<[1], [0], [0], [1], [0, 0, 1, 1], [], []>} : vector<16x8xbf16>, vector<8x16xbf16>, vector<16x16xf32> -> vector<16x16xf32>
    %cst_55 = arith.constant dense<0.000000e+00> : vector<16x16xf32>
    %132 = tpu.matmul %130, %104, %cst_55 {dimension_numbers = #tpu.dot_dimension_numbers<[1], [0], [0], [1], [0, 0, 1, 1], [], []>} : vector<16x8xbf16>, vector<8x16xbf16>, vector<16x16xf32> -> vector<16x16xf32>
    %133 = arith.addf %131, %132 : vector<16x16xf32>
    %134 = vector.extract_strided_slice %105 {offsets = [0, 40], sizes = [16, 8], strides = [1, 1]} : vector<16x48xbf16> to vector<16x8xbf16>
    %135 = vector.extract_strided_slice %108 {offsets = [0, 40], sizes = [16, 8], strides = [1, 1]} : vector<16x48xbf16> to vector<16x8xbf16>
    %cst_56 = arith.constant dense<0.000000e+00> : vector<16x16xf32>
    %136 = tpu.matmul %134, %104, %cst_56 {dimension_numbers = #tpu.dot_dimension_numbers<[1], [0], [0], [1], [0, 0, 1, 1], [], []>} : vector<16x8xbf16>, vector<8x16xbf16>, vector<16x16xf32> -> vector<16x16xf32>
    %cst_57 = arith.constant dense<0.000000e+00> : vector<16x16xf32>
    %137 = tpu.matmul %135, %104, %cst_57 {dimension_numbers = #tpu.dot_dimension_numbers<[1], [0], [0], [1], [0, 0, 1, 1], [], []>} : vector<16x8xbf16>, vector<8x16xbf16>, vector<16x16xf32> -> vector<16x16xf32>
    %138 = arith.addf %136, %137 : vector<16x16xf32>
    %139 = tpu.concatenate %113, %118, %123, %128, %133, %138 in 1 : vector<16x16xf32>, vector<16x16xf32>, vector<16x16xf32>, vector<16x16xf32>, vector<16x16xf32>, vector<16x16xf32> -> vector<16x96xf32>
    %cst_58 = arith.constant 5.000000e-01 : f32
    %140 = vector.broadcast %cst_58 : f32 to vector<16x96xf32>
    %141 = arith.addf %139, %140 : vector<16x96xf32>
    %142 = math.floor %141 : vector<16x96xf32>
    %cst_59 = arith.constant 0.000000e+00 : f32
    %cst_60 = arith.constant 2.550000e+02 : f32
    %143 = vector.broadcast %cst_59 : f32 to vector<16x96xf32>
    %144 = arith.maximumf %143, %142 : vector<16x96xf32>
    %145 = vector.broadcast %cst_60 : f32 to vector<16x96xf32>
    %146 = arith.minimumf %145, %144 : vector<16x96xf32>
    %147 = arith.truncf %146 : vector<16x96xf32> to vector<16x96xbf16>
    %148 = arith.subf %9, %147 : vector<16x96xbf16>
    %149 = arith.extf %148 : vector<16x96xbf16> to vector<16x96xf32>
    %cst_61 = arith.constant 0.000000e+00 : f32
    %cst_62 = arith.constant 2.550000e+02 : f32
    %150 = vector.broadcast %cst_61 : f32 to vector<16x96xf32>
    %151 = arith.maximumf %150, %149 : vector<16x96xf32>
    %152 = vector.broadcast %cst_62 : f32 to vector<16x96xf32>
    %153 = arith.minimumf %152, %151 : vector<16x96xf32>
    %cst_63 = arith.constant 0.00392156886 : f32
    %154 = vector.broadcast %cst_63 : f32 to vector<16x96xf32>
    %155 = arith.mulf %153, %154 : vector<16x96xf32>
    %c0_64 = arith.constant 0 : index
    %c0_65 = arith.constant 0 : index
    %c0_66 = arith.constant 0 : index
    %156 = vector.load %arg12[%c0_64, %c0_65, %c0_66] : memref<1x16x96xf32, #tpu.memory_space<vmem>>, vector<1x16x96xf32>
    %157 = vector.shape_cast %156 : vector<1x16x96xf32> to vector<16x96xf32>
    %158 = vector.shape_cast %155 : vector<16x96xf32> to vector<1x16x96xf32>
    tpu.vector_store %arg12[%c0_64, %c0_65, %c0_66], %158 {strides = array<i32>} : memref<1x16x96xf32, #tpu.memory_space<vmem>>, vector<1x16x96xf32>,
    %c0_67 = arith.constant 0 : index
    %c0_68 = arith.constant 0 : index
    %159 = vector.load %arg4[%c0_67, %c0_68] : memref<10x4xbf16, #tpu.memory_space<vmem>>, vector<10x4xbf16>
    %cst_69 = arith.constant dense<0.000000e+00> : vector<10x24xf32>
    %160 = tpu.matmul %159, %102, %cst_69 {dimension_numbers = #tpu.dot_dimension_numbers<[1], [0], [0], [1], [0, 0, 1, 1], [], []>} : vector<10x4xbf16>, vector<4x24xbf16>, vector<10x24xf32> -> vector<10x24xf32>
    %161 = vector.extract_strided_slice %160 {offsets = [0, 0], sizes = [2, 24], strides = [1, 1]} : vector<10x24xf32> to vector<2x24xf32>
    %c0_70 = arith.constant 0 : index
    %c0_71 = arith.constant 0 : index
    %162 = vector.load %arg8[%c0_70, %c0_71] : memref<4x2xbf16, #tpu.memory_space<vmem>>, vector<4x2xbf16>
    %163 = arith.truncf %161 : vector<2x24xf32> to vector<2x24xbf16>
    %164 = arith.extf %163 : vector<2x24xbf16> to vector<2x24xf32>
    %165 = arith.subf %161, %164 : vector<2x24xf32>
    %166 = arith.truncf %165 : vector<2x24xf32> to vector<2x24xbf16>
    %167 = vector.extract_strided_slice %163 {offsets = [0, 0], sizes = [2, 4], strides = [1, 1]} : vector<2x24xbf16> to vector<2x4xbf16>
    %168 = vector.extract_strided_slice %166 {offsets = [0, 0], sizes = [2, 4], strides = [1, 1]} : vector<2x24xbf16> to vector<2x4xbf16>
    %cst_72 = arith.constant dense<0.000000e+00> : vector<2x2xf32>
    %169 = tpu.matmul %167, %162, %cst_72 {dimension_numbers = #tpu.dot_dimension_numbers<[1], [0], [0], [1], [0, 0, 1, 1], [], []>} : vector<2x4xbf16>, vector<4x2xbf16>, vector<2x2xf32> -> vector<2x2xf32>
    %cst_73 = arith.constant dense<0.000000e+00> : vector<2x2xf32>
    %170 = tpu.matmul %168, %162, %cst_73 {dimension_numbers = #tpu.dot_dimension_numbers<[1], [0], [0], [1], [0, 0, 1, 1], [], []>} : vector<2x4xbf16>, vector<4x2xbf16>, vector<2x2xf32> -> vector<2x2xf32>
    %171 = arith.addf %169, %170 : vector<2x2xf32>
    %172 = vector.extract_strided_slice %163 {offsets = [0, 4], sizes = [2, 4], strides = [1, 1]} : vector<2x24xbf16> to vector<2x4xbf16>
    %173 = vector.extract_strided_slice %166 {offsets = [0, 4], sizes = [2, 4], strides = [1, 1]} : vector<2x24xbf16> to vector<2x4xbf16>
    %cst_74 = arith.constant dense<0.000000e+00> : vector<2x2xf32>
    %174 = tpu.matmul %172, %162, %cst_74 {dimension_numbers = #tpu.dot_dimension_numbers<[1], [0], [0], [1], [0, 0, 1, 1], [], []>} : vector<2x4xbf16>, vector<4x2xbf16>, vector<2x2xf32> -> vector<2x2xf32>
    %cst_75 = arith.constant dense<0.000000e+00> : vector<2x2xf32>
    %175 = tpu.matmul %173, %162, %cst_75 {dimension_numbers = #tpu.dot_dimension_numbers<[1], [0], [0], [1], [0, 0, 1, 1], [], []>} : vector<2x4xbf16>, vector<4x2xbf16>, vector<2x2xf32> -> vector<2x2xf32>
    %176 = arith.addf %174, %175 : vector<2x2xf32>
    %177 = vector.extract_strided_slice %163 {offsets = [0, 8], sizes = [2, 4], strides = [1, 1]} : vector<2x24xbf16> to vector<2x4xbf16>
    %178 = vector.extract_strided_slice %166 {offsets = [0, 8], sizes = [2, 4], strides = [1, 1]} : vector<2x24xbf16> to vector<2x4xbf16>
    %cst_76 = arith.constant dense<0.000000e+00> : vector<2x2xf32>
    %179 = tpu.matmul %177, %162, %cst_76 {dimension_numbers = #tpu.dot_dimension_numbers<[1], [0], [0], [1], [0, 0, 1, 1], [], []>} : vector<2x4xbf16>, vector<4x2xbf16>, vector<2x2xf32> -> vector<2x2xf32>
    %cst_77 = arith.constant dense<0.000000e+00> : vector<2x2xf32>
    %180 = tpu.matmul %178, %162, %cst_77 {dimension_numbers = #tpu.dot_dimension_numbers<[1], [0], [0], [1], [0, 0, 1, 1], [], []>} : vector<2x4xbf16>, vector<4x2xbf16>, vector<2x2xf32> -> vector<2x2xf32>
    %181 = arith.addf %179, %180 : vector<2x2xf32>
    %182 = vector.extract_strided_slice %163 {offsets = [0, 12], sizes = [2, 4], strides = [1, 1]} : vector<2x24xbf16> to vector<2x4xbf16>
    %183 = vector.extract_strided_slice %166 {offsets = [0, 12], sizes = [2, 4], strides = [1, 1]} : vector<2x24xbf16> to vector<2x4xbf16>
    %cst_78 = arith.constant dense<0.000000e+00> : vector<2x2xf32>
    %184 = tpu.matmul %182, %162, %cst_78 {dimension_numbers = #tpu.dot_dimension_numbers<[1], [0], [0], [1], [0, 0, 1, 1], [], []>} : vector<2x4xbf16>, vector<4x2xbf16>, vector<2x2xf32> -> vector<2x2xf32>
    %cst_79 = arith.constant dense<0.000000e+00> : vector<2x2xf32>
    %185 = tpu.matmul %183, %162, %cst_79 {dimension_numbers = #tpu.dot_dimension_numbers<[1], [0], [0], [1], [0, 0, 1, 1], [], []>} : vector<2x4xbf16>, vector<4x2xbf16>, vector<2x2xf32> -> vector<2x2xf32>
    %186 = arith.addf %184, %185 : vector<2x2xf32>
    %187 = vector.extract_strided_slice %163 {offsets = [0, 16], sizes = [2, 4], strides = [1, 1]} : vector<2x24xbf16> to vector<2x4xbf16>
    %188 = vector.extract_strided_slice %166 {offsets = [0, 16], sizes = [2, 4], strides = [1, 1]} : vector<2x24xbf16> to vector<2x4xbf16>
    %cst_80 = arith.constant dense<0.000000e+00> : vector<2x2xf32>
    %189 = tpu.matmul %187, %162, %cst_80 {dimension_numbers = #tpu.dot_dimension_numbers<[1], [0], [0], [1], [0, 0, 1, 1], [], []>} : vector<2x4xbf16>, vector<4x2xbf16>, vector<2x2xf32> -> vector<2x2xf32>
    %cst_81 = arith.constant dense<0.000000e+00> : vector<2x2xf32>
    %190 = tpu.matmul %188, %162, %cst_81 {dimension_numbers = #tpu.dot_dimension_numbers<[1], [0], [0], [1], [0, 0, 1, 1], [], []>} : vector<2x4xbf16>, vector<4x2xbf16>, vector<2x2xf32> -> vector<2x2xf32>
    %191 = arith.addf %189, %190 : vector<2x2xf32>
    %192 = vector.extract_strided_slice %163 {offsets = [0, 20], sizes = [2, 4], strides = [1, 1]} : vector<2x24xbf16> to vector<2x4xbf16>
    %193 = vector.extract_strided_slice %166 {offsets = [0, 20], sizes = [2, 4], strides = [1, 1]} : vector<2x24xbf16> to vector<2x4xbf16>
    %cst_82 = arith.constant dense<0.000000e+00> : vector<2x2xf32>
    %194 = tpu.matmul %192, %162, %cst_82 {dimension_numbers = #tpu.dot_dimension_numbers<[1], [0], [0], [1], [0, 0, 1, 1], [], []>} : vector<2x4xbf16>, vector<4x2xbf16>, vector<2x2xf32> -> vector<2x2xf32>
    %cst_83 = arith.constant dense<0.000000e+00> : vector<2x2xf32>
    %195 = tpu.matmul %193, %162, %cst_83 {dimension_numbers = #tpu.dot_dimension_numbers<[1], [0], [0], [1], [0, 0, 1, 1], [], []>} : vector<2x4xbf16>, vector<4x2xbf16>, vector<2x2xf32> -> vector<2x2xf32>
    %196 = arith.addf %194, %195 : vector<2x2xf32>
    %197 = tpu.concatenate %171, %176, %181, %186, %191, %196 in 1 : vector<2x2xf32>, vector<2x2xf32>, vector<2x2xf32>, vector<2x2xf32>, vector<2x2xf32>, vector<2x2xf32> -> vector<2x12xf32>
    %cst_84 = arith.constant 5.000000e-01 : f32
    %198 = vector.broadcast %cst_84 : f32 to vector<2x12xf32>
    %199 = arith.addf %197, %198 : vector<2x12xf32>
    %200 = math.floor %199 : vector<2x12xf32>
    %cst_85 = arith.constant 0.000000e+00 : f32
    %cst_86 = arith.constant 2.550000e+02 : f32
    %201 = vector.broadcast %cst_85 : f32 to vector<2x12xf32>
    %202 = arith.maximumf %201, %200 : vector<2x12xf32>
    %203 = vector.broadcast %cst_86 : f32 to vector<2x12xf32>
    %204 = arith.minimumf %203, %202 : vector<2x12xf32>
    %205 = arith.truncf %204 : vector<2x12xf32> to vector<2x12xbf16>
    %206 = vector.extract_strided_slice %160 {offsets = [2, 0], sizes = [8, 24], strides = [1, 1]} : vector<10x24xf32> to vector<8x24xf32>
    %c0_87 = arith.constant 0 : index
    %c0_88 = arith.constant 0 : index
    %207 = vector.load %arg10[%c0_87, %c0_88] : memref<4x8xbf16, #tpu.memory_space<vmem>>, vector<4x8xbf16>
    %208 = arith.truncf %206 : vector<8x24xf32> to vector<8x24xbf16>
    %209 = arith.extf %208 : vector<8x24xbf16> to vector<8x24xf32>
    %210 = arith.subf %206, %209 : vector<8x24xf32>
    %211 = arith.truncf %210 : vector<8x24xf32> to vector<8x24xbf16>
    %212 = vector.extract_strided_slice %208 {offsets = [0, 0], sizes = [8, 4], strides = [1, 1]} : vector<8x24xbf16> to vector<8x4xbf16>
    %213 = vector.extract_strided_slice %211 {offsets = [0, 0], sizes = [8, 4], strides = [1, 1]} : vector<8x24xbf16> to vector<8x4xbf16>
    %cst_89 = arith.constant dense<0.000000e+00> : vector<8x8xf32>
    %214 = tpu.matmul %212, %207, %cst_89 {dimension_numbers = #tpu.dot_dimension_numbers<[1], [0], [0], [1], [0, 0, 1, 1], [], []>} : vector<8x4xbf16>, vector<4x8xbf16>, vector<8x8xf32> -> vector<8x8xf32>
    %cst_90 = arith.constant dense<0.000000e+00> : vector<8x8xf32>
    %215 = tpu.matmul %213, %207, %cst_90 {dimension_numbers = #tpu.dot_dimension_numbers<[1], [0], [0], [1], [0, 0, 1, 1], [], []>} : vector<8x4xbf16>, vector<4x8xbf16>, vector<8x8xf32> -> vector<8x8xf32>
    %216 = arith.addf %214, %215 : vector<8x8xf32>
    %217 = vector.extract_strided_slice %208 {offsets = [0, 4], sizes = [8, 4], strides = [1, 1]} : vector<8x24xbf16> to vector<8x4xbf16>
    %218 = vector.extract_strided_slice %211 {offsets = [0, 4], sizes = [8, 4], strides = [1, 1]} : vector<8x24xbf16> to vector<8x4xbf16>
    %cst_91 = arith.constant dense<0.000000e+00> : vector<8x8xf32>
    %219 = tpu.matmul %217, %207, %cst_91 {dimension_numbers = #tpu.dot_dimension_numbers<[1], [0], [0], [1], [0, 0, 1, 1], [], []>} : vector<8x4xbf16>, vector<4x8xbf16>, vector<8x8xf32> -> vector<8x8xf32>
    %cst_92 = arith.constant dense<0.000000e+00> : vector<8x8xf32>
    %220 = tpu.matmul %218, %207, %cst_92 {dimension_numbers = #tpu.dot_dimension_numbers<[1], [0], [0], [1], [0, 0, 1, 1], [], []>} : vector<8x4xbf16>, vector<4x8xbf16>, vector<8x8xf32> -> vector<8x8xf32>
    %221 = arith.addf %219, %220 : vector<8x8xf32>
    %222 = vector.extract_strided_slice %208 {offsets = [0, 8], sizes = [8, 4], strides = [1, 1]} : vector<8x24xbf16> to vector<8x4xbf16>
    %223 = vector.extract_strided_slice %211 {offsets = [0, 8], sizes = [8, 4], strides = [1, 1]} : vector<8x24xbf16> to vector<8x4xbf16>
    %cst_93 = arith.constant dense<0.000000e+00> : vector<8x8xf32>
    %224 = tpu.matmul %222, %207, %cst_93 {dimension_numbers = #tpu.dot_dimension_numbers<[1], [0], [0], [1], [0, 0, 1, 1], [], []>} : vector<8x4xbf16>, vector<4x8xbf16>, vector<8x8xf32> -> vector<8x8xf32>
    %cst_94 = arith.constant dense<0.000000e+00> : vector<8x8xf32>
    %225 = tpu.matmul %223, %207, %cst_94 {dimension_numbers = #tpu.dot_dimension_numbers<[1], [0], [0], [1], [0, 0, 1, 1], [], []>} : vector<8x4xbf16>, vector<4x8xbf16>, vector<8x8xf32> -> vector<8x8xf32>
    %226 = arith.addf %224, %225 : vector<8x8xf32>
    %227 = vector.extract_strided_slice %208 {offsets = [0, 12], sizes = [8, 4], strides = [1, 1]} : vector<8x24xbf16> to vector<8x4xbf16>
    %228 = vector.extract_strided_slice %211 {offsets = [0, 12], sizes = [8, 4], strides = [1, 1]} : vector<8x24xbf16> to vector<8x4xbf16>
    %cst_95 = arith.constant dense<0.000000e+00> : vector<8x8xf32>
    %229 = tpu.matmul %227, %207, %cst_95 {dimension_numbers = #tpu.dot_dimension_numbers<[1], [0], [0], [1], [0, 0, 1, 1], [], []>} : vector<8x4xbf16>, vector<4x8xbf16>, vector<8x8xf32> -> vector<8x8xf32>
    %cst_96 = arith.constant dense<0.000000e+00> : vector<8x8xf32>
    %230 = tpu.matmul %228, %207, %cst_96 {dimension_numbers = #tpu.dot_dimension_numbers<[1], [0], [0], [1], [0, 0, 1, 1], [], []>} : vector<8x4xbf16>, vector<4x8xbf16>, vector<8x8xf32> -> vector<8x8xf32>
    %231 = arith.addf %229, %230 : vector<8x8xf32>
    %232 = vector.extract_strided_slice %208 {offsets = [0, 16], sizes = [8, 4], strides = [1, 1]} : vector<8x24xbf16> to vector<8x4xbf16>
    %233 = vector.extract_strided_slice %211 {offsets = [0, 16], sizes = [8, 4], strides = [1, 1]} : vector<8x24xbf16> to vector<8x4xbf16>
    %cst_97 = arith.constant dense<0.000000e+00> : vector<8x8xf32>
    %234 = tpu.matmul %232, %207, %cst_97 {dimension_numbers = #tpu.dot_dimension_numbers<[1], [0], [0], [1], [0, 0, 1, 1], [], []>} : vector<8x4xbf16>, vector<4x8xbf16>, vector<8x8xf32> -> vector<8x8xf32>
    %cst_98 = arith.constant dense<0.000000e+00> : vector<8x8xf32>
    %235 = tpu.matmul %233, %207, %cst_98 {dimension_numbers = #tpu.dot_dimension_numbers<[1], [0], [0], [1], [0, 0, 1, 1], [], []>} : vector<8x4xbf16>, vector<4x8xbf16>, vector<8x8xf32> -> vector<8x8xf32>
    %236 = arith.addf %234, %235 : vector<8x8xf32>
    %237 = vector.extract_strided_slice %208 {offsets = [0, 20], sizes = [8, 4], strides = [1, 1]} : vector<8x24xbf16> to vector<8x4xbf16>
    %238 = vector.extract_strided_slice %211 {offsets = [0, 20], sizes = [8, 4], strides = [1, 1]} : vector<8x24xbf16> to vector<8x4xbf16>
    %cst_99 = arith.constant dense<0.000000e+00> : vector<8x8xf32>
    %239 = tpu.matmul %237, %207, %cst_99 {dimension_numbers = #tpu.dot_dimension_numbers<[1], [0], [0], [1], [0, 0, 1, 1], [], []>} : vector<8x4xbf16>, vector<4x8xbf16>, vector<8x8xf32> -> vector<8x8xf32>
    %cst_100 = arith.constant dense<0.000000e+00> : vector<8x8xf32>
    %240 = tpu.matmul %238, %207, %cst_100 {dimension_numbers = #tpu.dot_dimension_numbers<[1], [0], [0], [1], [0, 0, 1, 1], [], []>} : vector<8x4xbf16>, vector<4x8xbf16>, vector<8x8xf32> -> vector<8x8xf32>
    %241 = arith.addf %239, %240 : vector<8x8xf32>
    %242 = tpu.concatenate %216, %221, %226, %231, %236, %241 in 1 : vector<8x8xf32>, vector<8x8xf32>, vector<8x8xf32>, vector<8x8xf32>, vector<8x8xf32>, vector<8x8xf32> -> vector<8x48xf32>
    %cst_101 = arith.constant 5.000000e-01 : f32
    %243 = vector.broadcast %cst_101 : f32 to vector<8x48xf32>
    %244 = arith.addf %242, %243 : vector<8x48xf32>
    %245 = math.floor %244 : vector<8x48xf32>
    %cst_102 = arith.constant 0.000000e+00 : f32
    %cst_103 = arith.constant 2.550000e+02 : f32
    %246 = vector.broadcast %cst_102 : f32 to vector<8x48xf32>
    %247 = arith.maximumf %246, %245 : vector<8x48xf32>
    %248 = vector.broadcast %cst_103 : f32 to vector<8x48xf32>
    %249 = arith.minimumf %248, %247 : vector<8x48xf32>
    %250 = arith.truncf %249 : vector<8x48xf32> to vector<8x48xbf16>
    %251 = arith.subf %55, %250 : vector<8x48xbf16>
    %252 = arith.extf %251 : vector<8x48xbf16> to vector<8x48xf32>
    %cst_104 = arith.constant 0.000000e+00 : f32
    %cst_105 = arith.constant 2.550000e+02 : f32
    %253 = vector.broadcast %cst_104 : f32 to vector<8x48xf32>
    %254 = arith.maximumf %253, %252 : vector<8x48xf32>
    %255 = vector.broadcast %cst_105 : f32 to vector<8x48xf32>
    %256 = arith.minimumf %255, %254 : vector<8x48xf32>
    %cst_106 = arith.constant 0.00392156886 : f32
    %257 = vector.broadcast %cst_106 : f32 to vector<8x48xf32>
    %258 = arith.mulf %256, %257 : vector<8x48xf32>
    %c0_107 = arith.constant 0 : index
    %c0_108 = arith.constant 0 : index
    %c0_109 = arith.constant 0 : index
    %259 = vector.load %arg13[%c0_107, %c0_108, %c0_109] : memref<1x8x48xf32, #tpu.memory_space<vmem>>, vector<1x8x48xf32>
    %260 = vector.shape_cast %259 : vector<1x8x48xf32> to vector<8x48xf32>
    %261 = vector.shape_cast %258 : vector<8x48xf32> to vector<1x8x48xf32>
    tpu.vector_store %arg13[%c0_107, %c0_108, %c0_109], %261 {strides = array<i32>} : memref<1x8x48xf32, #tpu.memory_space<vmem>>, vector<1x8x48xf32>,
    %c0_110 = arith.constant 0 : index
    %c0_111 = arith.constant 0 : index
    %262 = vector.load %arg5[%c0_110, %c0_111] : memref<4x2xbf16, #tpu.memory_space<vmem>>, vector<4x2xbf16>
    %cst_112 = arith.constant dense<0.000000e+00> : vector<4x12xf32>
    %263 = tpu.matmul %262, %205, %cst_112 {dimension_numbers = #tpu.dot_dimension_numbers<[1], [0], [0], [1], [0, 0, 1, 1], [], []>} : vector<4x2xbf16>, vector<2x12xbf16>, vector<4x12xf32> -> vector<4x12xf32>
    %c0_113 = arith.constant 0 : index
    %c0_114 = arith.constant 0 : index
    %264 = vector.load %arg11[%c0_113, %c0_114] : memref<2x4xbf16, #tpu.memory_space<vmem>>, vector<2x4xbf16>
    %265 = arith.truncf %263 : vector<4x12xf32> to vector<4x12xbf16>
    %266 = arith.extf %265 : vector<4x12xbf16> to vector<4x12xf32>
    %267 = arith.subf %263, %266 : vector<4x12xf32>
    %268 = arith.truncf %267 : vector<4x12xf32> to vector<4x12xbf16>
    %269 = vector.extract_strided_slice %265 {offsets = [0, 0], sizes = [4, 2], strides = [1, 1]} : vector<4x12xbf16> to vector<4x2xbf16>
    %270 = vector.extract_strided_slice %268 {offsets = [0, 0], sizes = [4, 2], strides = [1, 1]} : vector<4x12xbf16> to vector<4x2xbf16>
    %cst_115 = arith.constant dense<0.000000e+00> : vector<4x4xf32>
    %271 = tpu.matmul %269, %264, %cst_115 {dimension_numbers = #tpu.dot_dimension_numbers<[1], [0], [0], [1], [0, 0, 1, 1], [], []>} : vector<4x2xbf16>, vector<2x4xbf16>, vector<4x4xf32> -> vector<4x4xf32>
    %cst_116 = arith.constant dense<0.000000e+00> : vector<4x4xf32>
    %272 = tpu.matmul %270, %264, %cst_116 {dimension_numbers = #tpu.dot_dimension_numbers<[1], [0], [0], [1], [0, 0, 1, 1], [], []>} : vector<4x2xbf16>, vector<2x4xbf16>, vector<4x4xf32> -> vector<4x4xf32>
    %273 = arith.addf %271, %272 : vector<4x4xf32>
    %274 = vector.extract_strided_slice %265 {offsets = [0, 2], sizes = [4, 2], strides = [1, 1]} : vector<4x12xbf16> to vector<4x2xbf16>
    %275 = vector.extract_strided_slice %268 {offsets = [0, 2], sizes = [4, 2], strides = [1, 1]} : vector<4x12xbf16> to vector<4x2xbf16>
    %cst_117 = arith.constant dense<0.000000e+00> : vector<4x4xf32>
    %276 = tpu.matmul %274, %264, %cst_117 {dimension_numbers = #tpu.dot_dimension_numbers<[1], [0], [0], [1], [0, 0, 1, 1], [], []>} : vector<4x2xbf16>, vector<2x4xbf16>, vector<4x4xf32> -> vector<4x4xf32>
    %cst_118 = arith.constant dense<0.000000e+00> : vector<4x4xf32>
    %277 = tpu.matmul %275, %264, %cst_118 {dimension_numbers = #tpu.dot_dimension_numbers<[1], [0], [0], [1], [0, 0, 1, 1], [], []>} : vector<4x2xbf16>, vector<2x4xbf16>, vector<4x4xf32> -> vector<4x4xf32>
    %278 = arith.addf %276, %277 : vector<4x4xf32>
    %279 = vector.extract_strided_slice %265 {offsets = [0, 4], sizes = [4, 2], strides = [1, 1]} : vector<4x12xbf16> to vector<4x2xbf16>
    %280 = vector.extract_strided_slice %268 {offsets = [0, 4], sizes = [4, 2], strides = [1, 1]} : vector<4x12xbf16> to vector<4x2xbf16>
    %cst_119 = arith.constant dense<0.000000e+00> : vector<4x4xf32>
    %281 = tpu.matmul %279, %264, %cst_119 {dimension_numbers = #tpu.dot_dimension_numbers<[1], [0], [0], [1], [0, 0, 1, 1], [], []>} : vector<4x2xbf16>, vector<2x4xbf16>, vector<4x4xf32> -> vector<4x4xf32>
    %cst_120 = arith.constant dense<0.000000e+00> : vector<4x4xf32>
    %282 = tpu.matmul %280, %264, %cst_120 {dimension_numbers = #tpu.dot_dimension_numbers<[1], [0], [0], [1], [0, 0, 1, 1], [], []>} : vector<4x2xbf16>, vector<2x4xbf16>, vector<4x4xf32> -> vector<4x4xf32>
    %283 = arith.addf %281, %282 : vector<4x4xf32>
    %284 = vector.extract_strided_slice %265 {offsets = [0, 6], sizes = [4, 2], strides = [1, 1]} : vector<4x12xbf16> to vector<4x2xbf16>
    %285 = vector.extract_strided_slice %268 {offsets = [0, 6], sizes = [4, 2], strides = [1, 1]} : vector<4x12xbf16> to vector<4x2xbf16>
    %cst_121 = arith.constant dense<0.000000e+00> : vector<4x4xf32>
    %286 = tpu.matmul %284, %264, %cst_121 {dimension_numbers = #tpu.dot_dimension_numbers<[1], [0], [0], [1], [0, 0, 1, 1], [], []>} : vector<4x2xbf16>, vector<2x4xbf16>, vector<4x4xf32> -> vector<4x4xf32>
    %cst_122 = arith.constant dense<0.000000e+00> : vector<4x4xf32>
    %287 = tpu.matmul %285, %264, %cst_122 {dimension_numbers = #tpu.dot_dimension_numbers<[1], [0], [0], [1], [0, 0, 1, 1], [], []>} : vector<4x2xbf16>, vector<2x4xbf16>, vector<4x4xf32> -> vector<4x4xf32>
    %288 = arith.addf %286, %287 : vector<4x4xf32>
    %289 = vector.extract_strided_slice %265 {offsets = [0, 8], sizes = [4, 2], strides = [1, 1]} : vector<4x12xbf16> to vector<4x2xbf16>
    %290 = vector.extract_strided_slice %268 {offsets = [0, 8], sizes = [4, 2], strides = [1, 1]} : vector<4x12xbf16> to vector<4x2xbf16>
    %cst_123 = arith.constant dense<0.000000e+00> : vector<4x4xf32>
    %291 = tpu.matmul %289, %264, %cst_123 {dimension_numbers = #tpu.dot_dimension_numbers<[1], [0], [0], [1], [0, 0, 1, 1], [], []>} : vector<4x2xbf16>, vector<2x4xbf16>, vector<4x4xf32> -> vector<4x4xf32>
    %cst_124 = arith.constant dense<0.000000e+00> : vector<4x4xf32>
    %292 = tpu.matmul %290, %264, %cst_124 {dimension_numbers = #tpu.dot_dimension_numbers<[1], [0], [0], [1], [0, 0, 1, 1], [], []>} : vector<4x2xbf16>, vector<2x4xbf16>, vector<4x4xf32> -> vector<4x4xf32>
    %293 = arith.addf %291, %292 : vector<4x4xf32>
    %294 = vector.extract_strided_slice %265 {offsets = [0, 10], sizes = [4, 2], strides = [1, 1]} : vector<4x12xbf16> to vector<4x2xbf16>
    %295 = vector.extract_strided_slice %268 {offsets = [0, 10], sizes = [4, 2], strides = [1, 1]} : vector<4x12xbf16> to vector<4x2xbf16>
    %cst_125 = arith.constant dense<0.000000e+00> : vector<4x4xf32>
    %296 = tpu.matmul %294, %264, %cst_125 {dimension_numbers = #tpu.dot_dimension_numbers<[1], [0], [0], [1], [0, 0, 1, 1], [], []>} : vector<4x2xbf16>, vector<2x4xbf16>, vector<4x4xf32> -> vector<4x4xf32>
    %cst_126 = arith.constant dense<0.000000e+00> : vector<4x4xf32>
    %297 = tpu.matmul %295, %264, %cst_126 {dimension_numbers = #tpu.dot_dimension_numbers<[1], [0], [0], [1], [0, 0, 1, 1], [], []>} : vector<4x2xbf16>, vector<2x4xbf16>, vector<4x4xf32> -> vector<4x4xf32>
    %298 = arith.addf %296, %297 : vector<4x4xf32>
    %299 = tpu.concatenate %273, %278, %283, %288, %293, %298 in 1 : vector<4x4xf32>, vector<4x4xf32>, vector<4x4xf32>, vector<4x4xf32>, vector<4x4xf32>, vector<4x4xf32> -> vector<4x24xf32>
    %cst_127 = arith.constant 5.000000e-01 : f32
    %300 = vector.broadcast %cst_127 : f32 to vector<4x24xf32>
    %301 = arith.addf %299, %300 : vector<4x24xf32>
    %302 = math.floor %301 : vector<4x24xf32>
    %cst_128 = arith.constant 0.000000e+00 : f32
    %cst_129 = arith.constant 2.550000e+02 : f32
    %303 = vector.broadcast %cst_128 : f32 to vector<4x24xf32>
    %304 = arith.maximumf %303, %302 : vector<4x24xf32>
    %305 = vector.broadcast %cst_129 : f32 to vector<4x24xf32>
    %306 = arith.minimumf %305, %304 : vector<4x24xf32>
    %307 = arith.truncf %306 : vector<4x24xf32> to vector<4x24xbf16>
    %308 = arith.subf %102, %307 : vector<4x24xbf16>
    %309 = arith.extf %308 : vector<4x24xbf16> to vector<4x24xf32>
    %cst_130 = arith.constant 0.000000e+00 : f32
    %cst_131 = arith.constant 2.550000e+02 : f32
    %310 = vector.broadcast %cst_130 : f32 to vector<4x24xf32>
    %311 = arith.maximumf %310, %309 : vector<4x24xf32>
    %312 = vector.broadcast %cst_131 : f32 to vector<4x24xf32>
    %313 = arith.minimumf %312, %311 : vector<4x24xf32>
    %cst_132 = arith.constant 0.00392156886 : f32
    %314 = vector.broadcast %cst_132 : f32 to vector<4x24xf32>
    %315 = arith.mulf %313, %314 : vector<4x24xf32>
    %c0_133 = arith.constant 0 : index
    %c0_134 = arith.constant 0 : index
    %c0_135 = arith.constant 0 : index
    %316 = vector.load %arg14[%c0_133, %c0_134, %c0_135] : memref<1x4x24xf32, #tpu.memory_space<vmem>>, vector<1x4x24xf32>
    %317 = vector.shape_cast %316 : vector<1x4x24xf32> to vector<4x24xf32>
    %318 = vector.shape_cast %315 : vector<4x24xf32> to vector<1x4x24xf32>
    tpu.vector_store %arg14[%c0_133, %c0_134, %c0_135], %318 {strides = array<i32>} : memref<1x4x24xf32, #tpu.memory_space<vmem>>, vector<1x4x24xf32>,
    %319 = arith.extf %205 : vector<2x12xbf16> to vector<2x12xf32>
    %cst_136 = arith.constant 0.00392156886 : f32
    %320 = vector.broadcast %cst_136 : f32 to vector<2x12xf32>
    %321 = arith.mulf %319, %320 : vector<2x12xf32>
    %c0_137 = arith.constant 0 : index
    %c0_138 = arith.constant 0 : index
    %c0_139 = arith.constant 0 : index
    %322 = vector.load %arg15[%c0_137, %c0_138, %c0_139] : memref<1x2x12xf32, #tpu.memory_space<vmem>>, vector<1x2x12xf32>
    %323 = vector.shape_cast %322 : vector<1x2x12xf32> to vector<2x12xf32>
    %324 = vector.shape_cast %321 : vector<2x12xf32> to vector<1x2x12xf32>
    tpu.vector_store %arg15[%c0_137, %c0_138, %c0_139], %324 {strides = array<i32>} : memref<1x2x12xf32, #tpu.memory_space<vmem>>, vector<1x2x12xf32>,
    return
  }
  func.func @transform_0(%arg0: i32) -> (i32, i32, i32) {
    %c0_i32 = arith.constant 0 : i32
    %c0_i32_0 = arith.constant 0 : i32
    %c0_i32_1 = arith.constant 0 : i32
    return %arg0, %c0_i32, %c0_i32_0 : i32, i32, i32
  }
  func.func @transform_1(%arg0: i32) -> (i32, i32) {
    %c0_i32 = arith.constant 0 : i32
    %c0_i32_0 = arith.constant 0 : i32
    %c0_i32_1 = arith.constant 0 : i32
    return %c0_i32, %c0_i32_0 : i32, i32
  }
  func.func @transform_2(%arg0: i32) -> (i32, i32) {
    %c0_i32 = arith.constant 0 : i32
    %c0_i32_0 = arith.constant 0 : i32
    %c0_i32_1 = arith.constant 0 : i32
    return %c0_i32, %c0_i32_0 : i32, i32
  }
  func.func @transform_3(%arg0: i32) -> (i32, i32) {
    %c0_i32 = arith.constant 0 : i32
    %c0_i32_0 = arith.constant 0 : i32
    %c0_i32_1 = arith.constant 0 : i32
    return %c0_i32, %c0_i32_0 : i32, i32
  }
  func.func @transform_4(%arg0: i32) -> (i32, i32) {
    %c0_i32 = arith.constant 0 : i32
    %c0_i32_0 = arith.constant 0 : i32
    %c0_i32_1 = arith.constant 0 : i32
    return %c0_i32, %c0_i32_0 : i32, i32
  }
  func.func @transform_5(%arg0: i32) -> (i32, i32) {
    %c0_i32 = arith.constant 0 : i32
    %c0_i32_0 = arith.constant 0 : i32
    %c0_i32_1 = arith.constant 0 : i32
    return %c0_i32, %c0_i32_0 : i32, i32
  }
  func.func @transform_6(%arg0: i32) -> (i32, i32) {
    %c0_i32 = arith.constant 0 : i32
    %c0_i32_0 = arith.constant 0 : i32
    %c0_i32_1 = arith.constant 0 : i32
    return %c0_i32, %c0_i32_0 : i32, i32
  }
  func.func @transform_7(%arg0: i32) -> (i32, i32) {
    %c0_i32 = arith.constant 0 : i32
    %c0_i32_0 = arith.constant 0 : i32
    %c0_i32_1 = arith.constant 0 : i32
    return %c0_i32, %c0_i32_0 : i32, i32
  }
  func.func @transform_8(%arg0: i32) -> (i32, i32) {
    %c0_i32 = arith.constant 0 : i32
    %c0_i32_0 = arith.constant 0 : i32
    %c0_i32_1 = arith.constant 0 : i32
    return %c0_i32, %c0_i32_0 : i32, i32
  }
  func.func @transform_9(%arg0: i32) -> (i32, i32) {
    %c0_i32 = arith.constant 0 : i32
    %c0_i32_0 = arith.constant 0 : i32
    %c0_i32_1 = arith.constant 0 : i32
    return %c0_i32, %c0_i32_0 : i32, i32
  }
  func.func @transform_10(%arg0: i32) -> (i32, i32) {
    %c0_i32 = arith.constant 0 : i32
    %c0_i32_0 = arith.constant 0 : i32
    %c0_i32_1 = arith.constant 0 : i32
    return %c0_i32, %c0_i32_0 : i32, i32
  }
  func.func @transform_11(%arg0: i32) -> (i32, i32, i32) {
    %c0_i32 = arith.constant 0 : i32
    %c0_i32_0 = arith.constant 0 : i32
    %c0_i32_1 = arith.constant 0 : i32
    return %arg0, %c0_i32, %c0_i32_0 : i32, i32, i32
  }
  func.func @transform_12(%arg0: i32) -> (i32, i32, i32) {
    %c0_i32 = arith.constant 0 : i32
    %c0_i32_0 = arith.constant 0 : i32
    %c0_i32_1 = arith.constant 0 : i32
    return %arg0, %c0_i32, %c0_i32_0 : i32, i32, i32
  }
  func.func @transform_13(%arg0: i32) -> (i32, i32, i32) {
    %c0_i32 = arith.constant 0 : i32
    %c0_i32_0 = arith.constant 0 : i32
    %c0_i32_1 = arith.constant 0 : i32
    return %arg0, %c0_i32, %c0_i32_0 : i32, i32, i32
  }
  func.func @transform_14(%arg0: i32) -> (i32, i32, i32) {
    %c0_i32 = arith.constant 0 : i32
    %c0_i32_0 = arith.constant 0 : i32
    %c0_i32_1 = arith.constant 0 : i32
    return %arg0, %c0_i32, %c0_i32_0 : i32, i32, i32
  }
}

</mosaic_0001>

<bundles_post_ra>
// kernel: tpu_custom_call.1
= control target key start
LH: loop header
LB: loop body
LE: loop exit
PB: predicated region body
PF: predicated region fallthrough
CT: control target
= control target key end

     0   :  { %20 = vsyncpa [#allocation3], 0  ;;  %s6186_s0 = inlined_call_operand.hbm [shape: f32[1,16,96], index: 0, kind: input, shape index: {}]   ;;  %s6187_s1 = inlined_call_operand.hbm [shape: bf16[8,16], index: 1, kind: input, shape index: {}]   ;;  %s6188_s2 = inlined_call_operand.hbm [shape: bf16[20,8], index: 2, kind: input, shape index: {}]   ;;  %s6189_s3 = inlined_call_operand.hbm [shape: bf16[10,4], index: 3, kind: input, shape index: {}]   ;;  %s6190_s4 = inlined_call_operand.hbm [shape: bf16[4,2], index: 4, kind: input, shape index: {}]   ;;  %s6191_s5 = inlined_call_operand.hbm [shape: bf16[16,8], index: 5, kind: input, shape index: {}]   ;;  %s6192_s6 = inlined_call_operand.hbm [shape: bf16[8,4], index: 6, kind: input, shape index: {}]   ;;  %s6193_s7 = inlined_call_operand.hbm [shape: bf16[4,2], index: 7, kind: input, shape index: {}]   ;;  %s6194_s8 = inlined_call_operand.hbm [shape: bf16[8,16], index: 8, kind: input, shape index: {}]   ;;  %s6195_s9 = inlined_call_operand.hbm [shape: bf16[4,8], index: 9, kind: input, shape index: {}]   ;;  %s6196_s10 = inlined_call_operand.hbm [shape: bf16[2,4], index: 10, kind: input, shape index: {}]   ;;  %s6197_s11 = inlined_call_operand.hbm [shape: f32[1,16,96], index: 11, kind: output, shape index: {0}]   ;;  %s6198_s12 = inlined_call_operand.hbm [shape: f32[1,8,48], index: 12, kind: output, shape index: {1}]   ;;  %s6199_s13 = inlined_call_operand.hbm [shape: f32[1,4,24], index: 13, kind: output, shape index: {2}]   ;;  %s6200_s14 = inlined_call_operand.hbm [shape: f32[1,2,12], index: 14, kind: output, shape index: {3}]  }
   0x1   :  { %21 = vsyncpa [#allocation6], 0 }
   0x2   :  { %22 = vsyncpa [#allocation9], 0 }
   0x3   :  { %23 = vsyncpa [#allocation12], 0 }
   0x4   :  { %24 = vsyncpa [#allocation15], 0 }
   0x5   :  { %25 = vsyncpa [#allocation18], 0 }
   0x6   :  { %26 = vsyncpa [#allocation4], 0 }
   0x7   :  { %27 = vsyncpa [#allocation22], 0 }
   0x8   :  { %28 = vsyncpa [#allocation25], 0  ;;  %s5264_s29 = smov [#allocation5]   ;;  %s4916_s17 = scalar_lea.hbm %s6187_s1, 64 }
   0x9   :  { %s47_s30 = sshll.u32 %s5264_s29, 4  ;;  %p4917_p0 = scmp.ne.s32.totalorder %s6187_s1, %s4916_s17  ;;  %s48_s30 = int_to_ptr.vmem [resolvable:$true] %s47_s30 }
   0xa   :  { %p4920_p1 = scmp.lt.u32.totalorder %s4916_s17, %s6187_s1 }
   0xc   :  { %p4922_p2 = pnand %p4920_p1, %p4917_p0 }
   0xe   :  { %4925 = shalt.err (!%p4922_p2)
}
   0xf   :  { %s4926_s22 = scalar_lea.vmem %s48_s30, 64  ;;  %p4931_p4 = scmp.lt.s32.totalorder %s48_s30, %s48_s30 }
  0x10   :  { %p4927_p3 = scmp.ne.s32.totalorder %s48_s30, %s4926_s22  ;;  %p4932_p5 = scmp.lt.s32.totalorder %s4926_s22, %s4926_s22 }
  0x12   :  { %p4933_p6 = por %p4932_p5, %p4931_p4 }
  0x14   :  { %p4934_p7 = pnand %p4933_p6, %p4927_p3 }
  0x16   :  { %4937 = shalt.err (!%p4934_p7)
}
  0x17   :  { %50 = dma.hbm_to_vmem [thread:$0]  %s6187_s1, 64, %s48_s30, [#allocation6]  }
  0x18   :  { %s5265_s25 = smov [#allocation8]   ;;  %s5266_s27 = smov [#allocation11]  }
  0x19   :  { %s68_s26 = sshll.u32 %s5265_s25, 4  ;;  %s90_s28 = sshll.u32 %s5266_s27, 4  ;;  %s69_s26 = int_to_ptr.vmem [resolvable:$true] %s68_s26  ;;  %s91_s28 = int_to_ptr.vmem [resolvable:$true] %s90_s28 }
  0x1a   :  { %s4938_s16 = scalar_lea.hbm %s6189_s3, 128 }
  0x1b   :  { %p4939_p8 = scmp.ne.s32.totalorder %s6189_s3, %s4938_s16  ;;  %p4942_p9 = scmp.lt.u32.totalorder %s4938_s16, %s6189_s3 }
  0x1d   :  { %p4944_p10 = pnand %p4942_p9, %p4939_p8 }
  0x1f   :  { %4947 = shalt.err (!%p4944_p10)
}
  0x20   :  { %s4948_s1 = scalar_lea.vmem %s69_s26, 128  ;;  %p4953_p12 = scmp.lt.s32.totalorder %s69_s26, %s69_s26 }
  0x21   :  { %p4949_p11 = scmp.ne.s32.totalorder %s69_s26, %s4948_s1  ;;  %p4954_p13 = scmp.lt.s32.totalorder %s4948_s1, %s4948_s1 }
  0x23   :  { %p4955_p0 = por %p4954_p13, %p4953_p12 }
  0x25   :  { %p4956_p1 = pnand %p4955_p0, %p4949_p11 }
  0x27   :  { %4959 = shalt.err (!%p4956_p1)
}
  0x28   :  { %s5267_s30 = smov 64   ;;  %s5268_s21 = smov 4  }
  0x29   :  { %74 = dma.hbm_to_vmem [thread:$0]  %s6189_s3, 128, %s69_s26, [#allocation9], %s5267_s30, %s5267_s30, %s5268_s21  }
  0x2a   :  { %s4960_s27 = scalar_lea.hbm %s6191_s5, 128 }
  0x2b   :  { %p4961_p2 = scmp.ne.s32.totalorder %s6191_s5, %s4960_s27  ;;  %p4964_p3 = scmp.lt.u32.totalorder %s4960_s27, %s6191_s5 }
  0x2d   :  { %p4966_p4 = pnand %p4964_p3, %p4961_p2 }
  0x2f   :  { %4969 = shalt.err (!%p4966_p4)
}
  0x30   :  { %s4970_s18 = scalar_lea.vmem %s91_s28, 128  ;;  %p4975_p6 = scmp.lt.s32.totalorder %s91_s28, %s91_s28 }
  0x31   :  { %p4971_p5 = scmp.ne.s32.totalorder %s91_s28, %s4970_s18  ;;  %p4976_p7 = scmp.lt.s32.totalorder %s4970_s18, %s4970_s18 }
  0x33   :  { %p4977_p8 = por %p4976_p7, %p4975_p6 }
  0x35   :  { %p4978_p9 = pnand %p4977_p8, %p4971_p5 }
  0x37   :  { %4981 = shalt.err (!%p4978_p9)
}
  0x38   :  { %96 = dma.hbm_to_vmem [thread:$0]  %s6191_s5, 128, %s91_s28, [#allocation12], %s5267_s30, %s5267_s30, %s5268_s21  }
  0x39   :  { %s5269_s19 = smov [#allocation14]   ;;  %s5270_s1 = smov [#allocation17]  }
  0x3a   :  { %s113_s20 = sshll.u32 %s5269_s19, 4  ;;  %s133_s22 = sshll.u32 %s5270_s1, 4  ;;  %s114_s20 = int_to_ptr.vmem [resolvable:$true] %s113_s20  ;;  %s134_s22 = int_to_ptr.vmem [resolvable:$true] %s133_s22 }
  0x3b   :  { %s4982_s25 = scalar_lea.hbm %s6193_s7, 32 }
  0x3c   :  { %p4983_p10 = scmp.ne.s32.totalorder %s6193_s7, %s4982_s25  ;;  %p4986_p11 = scmp.lt.u32.totalorder %s4982_s25, %s6193_s7 }
  0x3e   :  { %p4988_p12 = pnand %p4986_p11, %p4983_p10 }
  0x40   :  { %4991 = shalt.err (!%p4988_p12)
}
  0x41   :  { %s4992_s5 = scalar_lea.vmem %s114_s20, 32  ;;  %p4997_p0 = scmp.lt.s32.totalorder %s114_s20, %s114_s20 }
  0x42   :  { %p4993_p13 = scmp.ne.s32.totalorder %s114_s20, %s4992_s5  ;;  %p4998_p1 = scmp.lt.s32.totalorder %s4992_s5, %s4992_s5 }
  0x44   :  { %p4999_p2 = por %p4998_p1, %p4997_p0 }
  0x46   :  { %p5000_p3 = pnand %p4999_p2, %p4993_p13 }
  0x48   :  { %5003 = shalt.err (!%p5000_p3)
}
  0x49   :  { %116 = dma.hbm_to_vmem [thread:$0]  %s6193_s7, 32, %s114_s20, [#allocation15]  }
  0x4a   :  { %s5004_s26 = scalar_lea.hbm %s6195_s9, 32 }
  0x4b   :  { %p5005_p4 = scmp.ne.s32.totalorder %s6195_s9, %s5004_s26  ;;  %p5008_p5 = scmp.lt.u32.totalorder %s5004_s26, %s6195_s9 }
  0x4d   :  { %p5010_p6 = pnand %p5008_p5, %p5005_p4 }
  0x4f   :  { %5013 = shalt.err (!%p5010_p6)
}
  0x50   :  { %s5014_s25 = scalar_lea.vmem %s134_s22, 32  ;;  %p5019_p8 = scmp.lt.s32.totalorder %s134_s22, %s134_s22 }
  0x51   :  { %p5015_p7 = scmp.ne.s32.totalorder %s134_s22, %s5014_s25  ;;  %p5020_p9 = scmp.lt.s32.totalorder %s5014_s25, %s5014_s25 }
  0x53   :  { %p5021_p10 = por %p5020_p9, %p5019_p8 }
  0x55   :  { %p5022_p11 = pnand %p5021_p10, %p5015_p7 }
  0x57   :  { %5025 = shalt.err (!%p5022_p11)
}
  0x58   :  { %136 = dma.hbm_to_vmem [thread:$0]  %s6195_s9, 32, %s134_s22, [#allocation18]  }
  0x59   :  { %s5271_s27 = smov [#allocation2]   ;;  %s5026_s5 = scalar_lea.hbm %s6186_s0, 256 }
  0x5a   :  { %s34_s29 = sshll.u32 %s5271_s27, 4  ;;  %p5027_p12 = scmp.ne.s32.totalorder %s6186_s0, %s5026_s5  ;;  %s35_s29 = int_to_ptr.vmem [resolvable:$true] %s34_s29 }
  0x5b   :  { %p5030_p13 = scmp.lt.u32.totalorder %s5026_s5, %s6186_s0 }
  0x5d   :  { %p5032_p0 = pnand %p5030_p13, %p5027_p12 }
  0x5f   :  { %5035 = shalt.err (!%p5032_p0)
}
  0x60   :  { %s5036_s26 = scalar_lea.vmem %s35_s29, 256  ;;  %p5041_p2 = scmp.lt.s32.totalorder %s35_s29, %s35_s29 }
  0x61   :  { %p5037_p1 = scmp.ne.s32.totalorder %s35_s29, %s5036_s26  ;;  %p5042_p3 = scmp.lt.s32.totalorder %s5036_s26, %s5036_s26 }
  0x63   :  { %p5043_p4 = por %p5042_p3, %p5041_p2 }
  0x65   :  { %p5044_p5 = pnand %p5043_p4, %p5037_p1 }
  0x67   :  { %5047 = shalt.err (!%p5044_p5)
}
  0x68   :  { %s5272_s9 = smov 128   ;;  %s5273_s22 = smov 8  }
  0x69   :  { %40 = dma.hbm_to_vmem [thread:$0]  %s6186_s0, 256, %s35_s29, [#allocation3], %s5272_s9, %s5272_s9, %s5273_s22  }
  0x6a   :  { %s5274_s23 = smov [#allocation7]   ;;  %s5275_s25 = smov [#allocation10]  }
  0x6b   :  { %s56_s24 = sshll.u32 %s5274_s23, 4  ;;  %s81_s7 = sshll.u32 %s5275_s25, 4  ;;  %s57_s24 = int_to_ptr.vmem [resolvable:$true] %s56_s24  ;;  %s82_s7 = int_to_ptr.vmem [resolvable:$true] %s81_s7 }
  0x6c   :  { %s5048_s15 = scalar_lea.hbm %s6188_s2, 192 }
  0x6d   :  { %p5049_p6 = scmp.ne.s32.totalorder %s6188_s2, %s5048_s15  ;;  %p5052_p7 = scmp.lt.u32.totalorder %s5048_s15, %s6188_s2 }
  0x6f   :  { %p5054_p8 = pnand %p5052_p7, %p5049_p6 }
  0x71   :  { %5057 = shalt.err (!%p5054_p8)
}
  0x72   :  { %s5058_s0 = scalar_lea.vmem %s57_s24, 192  ;;  %p5063_p10 = scmp.lt.s32.totalorder %s57_s24, %s57_s24 }
  0x73   :  { %p5059_p9 = scmp.ne.s32.totalorder %s57_s24, %s5058_s0  ;;  %p5064_p11 = scmp.lt.s32.totalorder %s5058_s0, %s5058_s0 }
  0x75   :  { %p5065_p12 = por %p5064_p11, %p5063_p10 }
  0x77   :  { %p5066_p13 = pnand %p5065_p12, %p5059_p9 }
  0x79   :  { %5069 = shalt.err (!%p5066_p13)
}
  0x7a   :  { %62 = dma.hbm_to_vmem [thread:$0]  %s6188_s2, 192, %s57_s24, [#allocation6], %s5267_s30, %s5267_s30, %s5268_s21  }
  0x7b   :  { %s5070_s19 = scalar_lea.hbm %s6190_s4, 32 }
  0x7c   :  { %p5071_p0 = scmp.ne.s32.totalorder %s6190_s4, %s5070_s19  ;;  %p5074_p1 = scmp.lt.u32.totalorder %s5070_s19, %s6190_s4 }
  0x7e   :  { %p5076_p2 = pnand %p5074_p1, %p5071_p0 }
  0x80   :  { %5079 = shalt.err (!%p5076_p2)
}
  0x81   :  { %s5080_s27 = scalar_lea.vmem %s82_s7, 32  ;;  %p5085_p4 = scmp.lt.s32.totalorder %s82_s7, %s82_s7 }
  0x82   :  { %p5081_p3 = scmp.ne.s32.totalorder %s82_s7, %s5080_s27  ;;  %p5086_p5 = scmp.lt.s32.totalorder %s5080_s27, %s5080_s27 }
  0x84   :  { %p5087_p6 = por %p5086_p5, %p5085_p4 }
  0x86   :  { %p5088_p7 = pnand %p5087_p6, %p5081_p3 }
  0x88   :  { %5091 = shalt.err (!%p5088_p7)
}
  0x89   :  { %84 = dma.hbm_to_vmem [thread:$0]  %s6190_s4, 32, %s82_s7, [#allocation9]  }
  0x8a   :  { %s5276_s15 = smov [#allocation13]   ;;  %s5277_s5 = smov [#allocation16]  }
  0x8b   :  { %s103_s16 = sshll.u32 %s5276_s15, 4  ;;  %s123_s28 = sshll.u32 %s5277_s5, 4  ;;  %s104_s16 = int_to_ptr.vmem [resolvable:$true] %s103_s16  ;;  %s124_s28 = int_to_ptr.vmem [resolvable:$true] %s123_s28 }
  0x8c   :  { %s5092_s29 = scalar_lea.hbm %s6192_s6, 64 }
  0x8d   :  { %p5093_p8 = scmp.ne.s32.totalorder %s6192_s6, %s5092_s29  ;;  %p5096_p9 = scmp.lt.u32.totalorder %s5092_s29, %s6192_s6 }
  0x8f   :  { %p5098_p10 = pnand %p5096_p9, %p5093_p8 }
  0x91   :  { %5101 = shalt.err (!%p5098_p10)
}
  0x92   :  { %s5102_s4 = scalar_lea.vmem %s104_s16, 64  ;;  %p5107_p12 = scmp.lt.s32.totalorder %s104_s16, %s104_s16 }
  0x93   :  { %p5103_p11 = scmp.ne.s32.totalorder %s104_s16, %s5102_s4  ;;  %p5108_p13 = scmp.lt.s32.totalorder %s5102_s4, %s5102_s4 }
  0x95   :  { %p5109_p0 = por %p5108_p13, %p5107_p12 }
  0x97   :  { %p5110_p1 = pnand %p5109_p0, %p5103_p11 }
  0x99   :  { %5113 = shalt.err (!%p5110_p1)
}
  0x9a   :  { %106 = dma.hbm_to_vmem [thread:$0]  %s6192_s6, 64, %s104_s16, [#allocation12]  }
  0x9b   :  { %s5114_s20 = scalar_lea.hbm %s6194_s8, 64 }
  0x9c   :  { %p5115_p2 = scmp.ne.s32.totalorder %s6194_s8, %s5114_s20  ;;  %p5118_p3 = scmp.lt.u32.totalorder %s5114_s20, %s6194_s8 }
  0x9e   :  { %p5120_p4 = pnand %p5118_p3, %p5115_p2 }
  0xa0   :  { %5123 = shalt.err (!%p5120_p4)
}
  0xa1   :  { %s5124_s5 = scalar_lea.vmem %s124_s28, 64  ;;  %p5129_p6 = scmp.lt.s32.totalorder %s124_s28, %s124_s28 }
  0xa2   :  { %p5125_p5 = scmp.ne.s32.totalorder %s124_s28, %s5124_s5  ;;  %p5130_p7 = scmp.lt.s32.totalorder %s5124_s5, %s5124_s5 }
  0xa4   :  { %p5131_p8 = por %p5130_p7, %p5129_p6 }
  0xa6   :  { %p5132_p9 = pnand %p5131_p8, %p5125_p5 }
  0xa8   :  { %5135 = shalt.err (!%p5132_p9)
}
  0xa9   :  { %126 = dma.hbm_to_vmem [thread:$0]  %s6194_s8, 64, %s124_s28, [#allocation15]  }
  0xaa   :  { %s5278_s17 = smov [#allocation19]   ;;  %s5136_s3 = scalar_lea.hbm %s6196_s10, 16 }
  0xab   :  { %s143_s0 = sshll.u32 %s5278_s17, 4  ;;  %p5137_p10 = scmp.ne.s32.totalorder %s6196_s10, %s5136_s3  ;;  %s144_s0 = int_to_ptr.vmem [resolvable:$true] %s143_s0 }
  0xac   :  { %p5140_p11 = scmp.lt.u32.totalorder %s5136_s3, %s6196_s10 }
  0xae   :  { %p5142_p12 = pnand %p5140_p11, %p5137_p10 }
  0xb0   :  { %5145 = shalt.err (!%p5142_p12)
}
  0xb1   :  { %s5146_s1 = scalar_lea.vmem %s144_s0, 16  ;;  %s5150_s8 = scalar_lea.vmem %s144_s0, 32 }
  0xb2   :  { %p5147_p13 = scmp.ne.s32.totalorder %s144_s0, %s5146_s1  ;;  %p5151_p0 = scmp.lt.s32.totalorder %s144_s0, %s144_s0 }
  0xb3   :  { %p5152_p1 = scmp.lt.s32.totalorder %s5150_s8, %s5146_s1 }
  0xb5   :  { %p5153_p2 = por %p5152_p1, %p5151_p0 }
  0xb7   :  { %p5154_p3 = pnand %p5153_p2, %p5147_p13 }
  0xb9   :  { %5157 = shalt.err (!%p5154_p3)
}
  0xba   :  { %146 = dma.hbm_to_vmem [thread:$0]  %s6196_s10, 16, %s144_s0, [#allocation18]  }
  0xbb   :  { %5246 = dma.done.wait [#allocation3], 256  }
  0xbc   :  { %5247 = vsyncadd [#allocation3], 4294967040 }
  0xbd   :  { %5248 = dma.done.wait [#allocation6], 256  }
  0xbe   :  { %5249 = vsyncadd [#allocation6], 4294967040 }
  0xbf   :  { %5250 = dma.done.wait [#allocation9], 160  }
  0xc0   :  { %5251 = vsyncadd [#allocation9], 4294967136 }
  0xc1   :  { %5252 = dma.done.wait [#allocation12], 192  }
  0xc2   :  { %5253 = vsyncadd [#allocation12], 4294967104 }
  0xc3   :  { %5254 = dma.done.wait [#allocation15], 96  }
  0xc4   :  { %5255 = vsyncadd [#allocation15], 4294967200 }
  0xc5   :  { %5256 = dma.done.wait [#allocation18], 48  }
  0xc6   :  { %5257 = vsyncadd [#allocation18], 4294967248  ;;  %v5279_v0 = vmov 0.0   ;;  %vm5280_vm0 = vmmov 0   ;;  %v181_v1 = vld [vmem:[#allocation2] sm:$0xff]  ;;  %v182_v2 = vld [vmem:[#allocation2 + $0x8] sm:$0xff] }
  0xc7   :  { %4268 = vmatprep.subr.bf16.mxu0 %v5279_v0  ;;  %4270 = vmatprep.mubr.msk.bf16.mxu0 %vm5280_vm0, %v5279_v0  ;;  %v183_v3 = vmul.f32 255.0, %v181_v1  ;;  %v184_v4 = vmul.f32 255.0, %v182_v2  ;;  %v192_v12 = vld [vmem:[#allocation5] sm:$0xf]  ;;  %vm193_vm1 = vcmask 130048   ;;  %s5281_s10 = smov 96  }
  0xc8   :  { %4274 = vmatprep.subr.bf16.mxu1 %v5279_v0  ;;  %4276 = vmatprep.mubr.msk.bf16.mxu1 %vm5280_vm0, %v5279_v0  ;;  %v5539_v13 = vld [vmem:[#allocation11] sm:$0xff]   ;;  %s5282_s25 = smov 112   ;;  %s5283_s20 = smov 80   ;;  %vm838_vm2 = vcmask 1043456   ;;  %v890_v52 = vld [vmem:[#allocation13] sm:$0xf] }
  0xc9   :  { %v185_v5 = vfloor.f32 %v183_v3  ;;  %v186_v6 = vfloor.f32 %v184_v4  ;;  %4275 = vmatpush3.bf16.msra.mxu1 %v5539_v13  ;;  %s5284_s27 = smov 48   ;;  %s5285_s2 = smov 16   ;;  %v5613_v54 = vsel %vm838_vm2, %v890_v52, 0  ;;  %v4913_v55 = vld [vmem:[#allocation7] sm:$0xff]   ;;  %vm807_vm3 = vcmask 64512  }
  0xca   :  { %4280 = vmatprep.subr.bf16.mxu1 %v5279_v0  ;;  %s5286_s24 = smov 32   ;;  %s5287_s15 = smov 24   ;;  %vm810_vm4 = vcmask 195584   ;;  %vm812_vm5 = vcmask 261120   ;;  %vm814_vm6 = vcmask 326656   ;;  %vm1482_vm7 = vcmask 1045504  }
  0xcb   :  { %v187_v7 = vmax.f32 %v185_v5, 0.0  ;;  %v188_v8 = vmax.f32 %v186_v6, 0.0  ;;  %s5288_s5 = smov 40   ;;  %s5289_s6 = smov 120   ;;  %vm1456_vm8 = vcmask 31744   ;;  %vm1459_vm9 = vcmask 97280  }
  0xcc   :  { %s5290_s16 = smov 104   ;;  %s5291_s17 = smov 88   ;;  %vm1462_vm10 = vcmask 162816   ;;  %vm2126_vm11 = vcmask 1041408   ;;  %vm2737_vm12 = vcmask 15360   ;;  %vm2740_vm13 = vcmask 48128  }
  0xcd   :  { %v189_v9 = vmin.f32 %v187_v7, 255.0  ;;  %v190_v10 = vmin.f32 %v188_v8, 255.0  ;;  %s5292_s0 = smov 12   ;;  %s5293_s29 = smov 20   ;;  %vm2743_vm14 = vcmask 80896   ;;  %vm3340_vm15 = vcmask 1040384  }
  0xce   :  { %s5294_s18 = smov 124   ;;  %s5295_s3 = smov 116  }
  0xcf   :  { %v5532_v11 = vpack.c.bf16 %v190_v10, %v189_v9  ;;  %s5296_s26 = smov 108   ;;  %s5297_s19 = smov 2  }
  0xd0   :  { %s5298_s4 = smov 6   ;;  %s5299_s7 = smov 10  }
  0xd1   :  { %4269 = vmatpush3.bf16.msra.mxu0 %v5532_v11  ;;  %s5300_s1 = smov 126   ;;  %s5301_s8 = smov 122  }
  0xd2   :  { %4286 = vmatprep.subr.bf16.mxu0 %v5279_v0  ;;  %s5302_s28 = smov 118  }
  0xd4   :  { %4271 = vmatmul.mubr.msk.bf16.vlgmr.msra.gmra.mrb[0].mxu0 %vm193_vm1, %v192_v12 }
  0xd5   :  { %4288 = vmatprep.mubr.msk.bf16.mxu0 %vm5280_vm0, %v5279_v0  ;;  %4287 = vmatpush3.bf16.msra.mxu0 %v5539_v13 }
  0xd6   :  { %4292 = vmatprep.subr.bf16.mxu0 %v5279_v0 }
 0x1a7   :  { %v231_v14 = vpop.f32.mrb[0].mxu0 }
 0x1a8   :  { %v239_v15 = vpack.c.bf16 %v231_v14, %v231_v14  ;;  %v4272_v16 = vpop.f32.mrb[1].mxu0 }
 0x1a9   :  { %v234_v17 = vpop.f32.mrb[2].mxu0 }
 0x1aa   :  { %v240_v18 = vunpack.c.l.bf16 %v239_v15  ;;  %v4273_v19 = vpop.f32.mrb[3].mxu0 }
 0x1ac   :  { %v241_v20 = vsub.f32 %v231_v14, %v240_v18 }
 0x1ae   :  { %v242_v21 = vpack.c.bf16 %v241_v20, %v241_v20 }
 0x1b0   :  { %427 = vrot.lane.b32.xlu1 %v242_v21, %s5281_s10  ;;  %336 = vrot.lane.b32.xlu0 %v242_v21, %s5282_s25 }
 0x1b1   :  { %4277 = vmatmul.mubr.msk.bf16.vlgmr.msra.gmra.mrb[0].mxu1 %vm193_vm1, %v242_v21 }
 0x1b2   :  { %4281 = vmatpush3.bf16.msra.mxu1 %v5539_v13  ;;  %4282 = vmatprep.mubr.msk.bf16.mxu1 %vm5280_vm0, %v5279_v0 }
 0x1b3   :  { %4298 = vmatprep.subr.bf16.mxu1 %v5279_v0 }
 0x1b4   :  { %517 = vrot.lane.b32.xlu1 %v242_v21, %s5283_s20  ;;  %382 = vrot.lane.b32.xlu0 %v239_v15, %s5282_s25 }
 0x1b8   :  { %562 = vrot.lane.b32.xlu1 %v239_v15, %s5283_s20  ;;  %472 = vrot.lane.b32.xlu0 %v239_v15, %s5281_s10 }
 0x1bc   :  { %697 = vrot.lane.b32.xlu1 %v242_v21, %s5284_s27  ;;  %607 = vrot.lane.b32.xlu0 %v242_v21, %s5267_s30 }
 0x1bd   :  { %4283 = vmatmul.mubr.msk.bf16.vlgmr.msra.gmra.mrb[0].mxu1 %vm193_vm1, %v239_v15 }
 0x1be   :  { %4299 = vmatpush3.bf16.msra.mxu1 %v5539_v13  ;;  %4300 = vmatprep.mubr.msk.bf16.mxu1 %vm5280_vm0, %v5279_v0 }
 0x1bf   :  { %4304 = vmatprep.subr.bf16.mxu1 %v5279_v0 }
 0x1c0   :  { %742 = vrot.lane.b32.xlu1 %v239_v15, %s5284_s27  ;;  %652 = vrot.lane.b32.xlu0 %v239_v15, %s5267_s30 }
 0x222   :  { %v428_v22 = vpop.permute.xlu1 %427  ;;  %v337_v23 = vpop.permute.xlu0 %336 }
 0x223   :  { %4289 = vmatmul.mubr.msk.bf16.vlgmr.msra.gmra.mrb[4].mxu0 %vm193_vm1, %v337_v23  ;;  %4301 = vmatmul.mubr.msk.bf16.vlgmr.msra.gmra.mrb[4].mxu1 %vm193_vm1, %v428_v22 }
 0x224   :  { %4293 = vmatpush3.bf16.msra.mxu0 %v5539_v13  ;;  %4305 = vmatpush3.bf16.msra.mxu1 %v5539_v13 }
 0x225   :  { %4294 = vmatprep.mubr.msk.bf16.mxu0 %vm5280_vm0, %v5279_v0  ;;  %4306 = vmatprep.mubr.msk.bf16.mxu1 %vm5280_vm0, %v5279_v0 }
 0x226   :  { %4310 = vmatprep.subr.bf16.mxu0 %v5279_v0  ;;  %4322 = vmatprep.subr.bf16.mxu1 %v5279_v0  ;;  %v383_v24 = vpop.permute.xlu0 %382  ;;  %v518_v26 = vpop.permute.xlu1 %517 }
 0x22a   :  { %v473_v25 = vpop.permute.xlu0 %472  ;;  %v563_v28 = vpop.permute.xlu1 %562 }
 0x22e   :  { %v608_v27 = vpop.permute.xlu0 %607  ;;  %v698_v30 = vpop.permute.xlu1 %697 }
 0x22f   :  { %4295 = vmatmul.mubr.msk.bf16.vlgmr.msra.gmra.mrb[4].mxu0 %vm193_vm1, %v383_v24  ;;  %4307 = vmatmul.mubr.msk.bf16.vlgmr.msra.gmra.mrb[4].mxu1 %vm193_vm1, %v473_v25 }
 0x230   :  { %4311 = vmatpush3.bf16.msra.mxu0 %v5539_v13  ;;  %4323 = vmatpush3.bf16.msra.mxu1 %v5539_v13 }
 0x231   :  { %4312 = vmatprep.mubr.msk.bf16.mxu0 %vm5280_vm0, %v5279_v0  ;;  %4324 = vmatprep.mubr.msk.bf16.mxu1 %vm5280_vm0, %v5279_v0 }
 0x232   :  { %4316 = vmatprep.subr.bf16.mxu0 %v5279_v0  ;;  %4328 = vmatprep.subr.bf16.mxu1 %v5279_v0  ;;  %v653_v29 = vpop.permute.xlu0 %652  ;;  %v743_v31 = vpop.permute.xlu1 %742 }
 0x237   :  { %4313 = vmatmul.mubr.msk.bf16.vlgmr.msra.gmra.mrb[8].mxu0 %vm193_vm1, %v518_v26  ;;  %4325 = vmatmul.mubr.msk.bf16.vlgmr.msra.gmra.mrb[8].mxu1 %vm193_vm1, %v608_v27 }
 0x238   :  { %4317 = vmatpush3.bf16.msra.mxu0 %v5539_v13  ;;  %4329 = vmatpush3.bf16.msra.mxu1 %v5539_v13 }
 0x239   :  { %4318 = vmatprep.mubr.msk.bf16.mxu0 %vm5280_vm0, %v5279_v0  ;;  %4330 = vmatprep.mubr.msk.bf16.mxu1 %vm5280_vm0, %v5279_v0 }
 0x23a   :  { %4334 = vmatprep.subr.bf16.mxu0 %v5279_v0 }
 0x243   :  { %4319 = vmatmul.mubr.msk.bf16.vlgmr.msra.gmra.mrb[8].mxu0 %vm193_vm1, %v563_v28  ;;  %4331 = vmatmul.mubr.msk.bf16.vlgmr.msra.gmra.mrb[8].mxu1 %vm193_vm1, %v653_v29 }
 0x244   :  { %4335 = vmatpush3.bf16.msra.mxu0 %v5539_v13  ;;  %4336 = vmatprep.mubr.msk.bf16.mxu0 %vm5280_vm0, %v5279_v0 }
 0x245   :  { %4340 = vmatprep.subr.bf16.mxu0 %v5279_v0  ;;  %4348 = vmatprep.mubr.msk.bf16.mxu1 %vm807_vm3, %v4913_v55 }
 0x24b   :  { %4337 = vmatmul.mubr.msk.bf16.vlgmr.msra.gmra.mrb[12].mxu0 %vm193_vm1, %v698_v30 }
 0x24c   :  { %4341 = vmatpush3.bf16.msra.mxu0 %v5539_v13  ;;  %4342 = vmatprep.mubr.msk.bf16.mxu0 %vm5280_vm0, %v5279_v0  ;;  %v4914_v13 = vld [vmem:[#allocation7 + $0x8] ss:$0 sps:$4 sm:$0x33]  }
 0x24d   :  { %4352 = vmatprep.subr.bf16.mxu0 %v5279_v0 }
 0x257   :  { %4343 = vmatmul.mubr.msk.bf16.vlgmr.msra.gmra.mrb[12].mxu0 %vm193_vm1, %v743_v31 }
 0x258   :  { %4354 = vmatprep.mubr.msk.bf16.mxu0 %vm5280_vm0, %v5279_v0  ;;  %4353 = vmatpush3.bf16.msra.mxu0 %v5613_v54 }
 0x259   :  { %4358 = vmatprep.subr.bf16.mxu0 %v5279_v0 }
 0x290   :  { %v329_v32 = vpop.f32.mrb[0].mxu1 }
 0x291   :  { %v4284_v33 = vpop.f32.mrb[1].mxu1 }
 0x292   :  { %v332_v34 = vpop.f32.mrb[2].mxu1 }
 0x293   :  { %v4285_v35 = vpop.f32.mrb[3].mxu1 }
 0x302   :  { %v421_v36 = vpop.f32.mrb[4].mxu0  ;;  %v511_v37 = vpop.f32.mrb[4].mxu1 }
 0x303   :  { %792 = vrot.lane.b32.xlu1 %v511_v37, %s5285_s2  ;;  %v4308_v38 = vpop.f32.mrb[5].mxu1  ;;  %788 = vrot.lane.b32.xlu0 %v421_v36, %s5273_s22  ;;  %v4296_v39 = vpop.f32.mrb[5].mxu0 }
 0x304   :  { %v424_v40 = vpop.f32.mrb[6].mxu0  ;;  %v514_v41 = vpop.f32.mrb[6].mxu1 }
 0x305   :  { %v4297_v42 = vpop.f32.mrb[7].mxu0  ;;  %v4309_v43 = vpop.f32.mrb[7].mxu1 }
 0x316   :  { %v601_v44 = vpop.f32.mrb[8].mxu0  ;;  %v691_v45 = vpop.f32.mrb[8].mxu1 }
 0x317   :  { %800 = vrot.lane.b32.xlu1 %v691_v45, %s5286_s24  ;;  %v4332_v46 = vpop.f32.mrb[9].mxu1  ;;  %796 = vrot.lane.b32.xlu0 %v601_v44, %s5287_s15  ;;  %v4320_v47 = vpop.f32.mrb[9].mxu0  ;;  %v1469_v44 = vld [vmem:[#allocation16] sm:$0xf] }
 0x318   :  { %v604_v48 = vpop.f32.mrb[10].mxu0  ;;  %v694_v49 = vpop.f32.mrb[10].mxu1  ;;  %v5703_v46 = vsel %vm838_vm2, %v1469_v44, 0 }
 0x319   :  { %v4321_v50 = vpop.f32.mrb[11].mxu0  ;;  %v4333_v51 = vpop.f32.mrb[11].mxu1 }
 0x32a   :  { %v781_v53 = vpop.f32.mrb[12].mxu0 }
 0x32b   :  { %804 = vrot.lane.b32.xlu0 %v781_v53, %s5288_s5  ;;  %v4344_v56 = vpop.f32.mrb[13].mxu0 }
 0x32c   :  { %v784_v57 = vpop.f32.mrb[14].mxu0 }
 0x32d   :  { %v4345_v58 = vpop.f32.mrb[15].mxu0 }
 0x375   :  { %v789_v59 = vpop.permute.xlu0 %788  ;;  %v793_v60 = vpop.permute.xlu1 %792 }
 0x376   :  { %v808_v61 = vsel %vm807_vm3, %v329_v32, %v789_v59 }
 0x377   :  { %v809_v63 = vsel %vm193_vm1, %v808_v61, %v793_v60 }
 0x389   :  { %v797_v62 = vpop.permute.xlu0 %796  ;;  %v801_v1 = vpop.permute.xlu1 %800 }
 0x38a   :  { %v811_v2 = vsel %vm810_vm4, %v809_v63, %v797_v62 }
 0x38b   :  { %v813_v3 = vsel %vm812_vm5, %v811_v2, %v801_v1 }
 0x39d   :  { %v805_v4 = vpop.permute.xlu0 %804 }
 0x39e   :  { %v815_v5 = vsel %vm814_vm6, %v813_v3, %v805_v4 }
 0x39f   :  { %v816_v6 = vadd.f32 0.5, %v815_v5 }
 0x3a1   :  { %v817_v7 = vfloor.f32 %v816_v6 }
 0x3a3   :  { %v818_v8 = vmax.f32 %v817_v7, 0.0 }
 0x3a5   :  { %v819_v9 = vmin.f32 %v818_v8, 255.0 }
 0x3a7   :  { %v5624_v10 = vpack.c.bf16 %v819_v9, %v819_v9 }
 0x3a9   :  { %4868 = vmatprep.subr.msk.bf16.mxu1 %vm838_vm2, %v5624_v10  ;;  %v840_v12 = vsel %vm838_vm2, %v5624_v10, 0  ;;  %vm3969_vm2 = vcmask 91136  }
 0x3aa   :  { %4347 = vmatpush3.bf16.msra.mxu1 %v840_v12 }
 0x3ab   :  { %4364 = vmatprep.subr.bf16.mxu1 %v5279_v0 }
 0x3ad   :  { %4349 = vmatmul.mubr.msk.bf16.vlgmr.msra.gmra.mrb[12].mxu1 %vm807_vm3, %v4914_v13 }
 0x3ae   :  { %4365 = vmatpush3.bf16.msra.mxu1 %v5613_v54  ;;  %4366 = vmatprep.mubr.msk.bf16.mxu1 %vm5280_vm0, %v5279_v0 }
 0x3af   :  { %4370 = vmatprep.subr.bf16.mxu1 %v5279_v0 }
 0x480   :  { %v4350_v14 = vpop.f32.mrb[12].mxu1 }
 0x481   :  { %v1471_v15 = vpack.c.bf16 %v4350_v14, %v4350_v14  ;;  %v876_v16 = vpop.f32.mrb[13].mxu1 }
 0x482   :  { %v891_v17 = vpack.c.bf16 %v876_v16, %v876_v16  ;;  %v4351_v18 = vpop.f32.mrb[14].mxu1 }
 0x483   :  { %v1474_v19 = vunpack.c.l.bf16 %v1471_v15  ;;  %v879_v20 = vpop.f32.mrb[15].mxu1  ;;  %v1536_v24 = vrot.slane %v1471_v15, 2 }
 0x484   :  { %v892_v21 = vunpack.c.l.bf16 %v891_v17  ;;  %v1470_v22 = vpack.c.bf16 %v879_v20, %v876_v16  ;;  %1031 = vrot.lane.b32.xlu0 %v891_v17, %s5289_s6 }
 0x485   :  { %v1477_v23 = vsub.f32 %v4350_v14, %v1474_v19 }
 0x486   :  { %v893_v25 = vsub.f32 %v876_v16, %v892_v21  ;;  %v1472_v26 = vunpack.c.l.bf16 %v1470_v22  ;;  %v1473_v27 = vunpack.c.h.bf16 %v1470_v22  ;;  %v1535_v28 = vrot.slane %v1470_v22, 2 }
 0x487   :  { %v1479_v29 = vpack.c.bf16 %v1477_v23, %v1477_v23 }
 0x488   :  { %v894_v30 = vpack.c.bf16 %v893_v25, %v893_v25  ;;  %v1475_v31 = vsub.f32 %v876_v16, %v1472_v26  ;;  %v1476_v32 = vsub.f32 %v879_v20, %v1473_v27  ;;  %v5638_v33 = vsel %vm1482_vm7, %v1535_v28, %v1536_v24 }
 0x489   :  { %v1484_v35 = vrot.slane %v1479_v29, 2 }
 0x48a   :  { %v1478_v34 = vpack.c.bf16 %v1476_v32, %v1475_v31  ;;  %1166 = vrot.lane.b32.xlu0 %v894_v30, %s5290_s16  ;;  %985 = vrot.lane.b32.xlu1 %v894_v30, %s5289_s6 }
 0x48b   :  { %4355 = vmatmul.mubr.msk.bf16.vlgmr.msra.gmra.mrb[16].mxu0 %vm807_vm3, %v894_v30 }
 0x48c   :  { %v1483_v36 = vrot.slane %v1478_v34, 2  ;;  %4359 = vmatpush3.bf16.msra.mxu0 %v5613_v54  ;;  %4360 = vmatprep.mubr.msk.bf16.mxu0 %vm5280_vm0, %v5279_v0 }
 0x48d   :  { %4376 = vmatprep.subr.bf16.mxu0 %v5279_v0 }
 0x48e   :  { %1211 = vrot.lane.b32.xlu0 %v891_v17, %s5290_s16  ;;  %1076 = vrot.lane.b32.xlu1 %v894_v30, %s5282_s25  ;;  %v5650_v37 = vsel %vm1482_vm7, %v1483_v36, %v1484_v35  ;;  %vm2086_vm7 = vcmask 392192  }
 0x492   :  { %1346 = vrot.lane.b32.xlu0 %v894_v30, %s5291_s17  ;;  %1121 = vrot.lane.b32.xlu1 %v891_v17, %s5282_s25 }
 0x496   :  { %1391 = vrot.lane.b32.xlu0 %v891_v17, %s5291_s17  ;;  %1256 = vrot.lane.b32.xlu1 %v894_v30, %s5281_s10 }
 0x497   :  { %4361 = vmatmul.mubr.msk.bf16.vlgmr.msra.gmra.mrb[16].mxu0 %vm807_vm3, %v891_v17 }
 0x498   :  { %4377 = vmatpush3.bf16.msra.mxu0 %v5613_v54  ;;  %4378 = vmatprep.mubr.msk.bf16.mxu0 %vm5280_vm0, %v5279_v0 }
 0x499   :  { %4382 = vmatprep.subr.bf16.mxu0 %v5279_v0 }
 0x49a   :  { %1301 = vrot.lane.b32.xlu1 %v891_v17, %s5281_s10  ;;  %1720 = vrot.lane.b32.xlu0 %v5638_v33, %s5282_s25 }
 0x49e   :  { %1674 = vrot.lane.b32.xlu1 %v5650_v37, %s5282_s25 }
 0x4a2   :  { %1858 = vrot.lane.b32.xlu1 %v5650_v37, %s5281_s10 }
 0x4f6   :  { %v1032_v40 = vpop.permute.xlu0 %1031 }
 0x4fc   :  { %v986_v38 = vpop.permute.xlu1 %985  ;;  %v1167_v42 = vpop.permute.xlu0 %1166 }
 0x4fd   :  { %4367 = vmatmul.mubr.msk.bf16.vlgmr.msra.gmra.mrb[16].mxu1 %vm807_vm3, %v986_v38 }
 0x4fe   :  { %4371 = vmatpush3.bf16.msra.mxu1 %v5613_v54  ;;  %4372 = vmatprep.mubr.msk.bf16.mxu1 %vm5280_vm0, %v5279_v0 }
 0x4ff   :  { %4388 = vmatprep.subr.bf16.mxu1 %v5279_v0 }
 0x500   :  { %v1077_v39 = vpop.permute.xlu1 %1076  ;;  %v1212_v45 = vpop.permute.xlu0 %1211 }
 0x501   :  { %4379 = vmatmul.mubr.msk.bf16.vlgmr.msra.gmra.mrb[20].mxu0 %vm807_vm3, %v1077_v39 }
 0x502   :  { %4383 = vmatpush3.bf16.msra.mxu0 %v5613_v54  ;;  %4384 = vmatprep.mubr.msk.bf16.mxu0 %vm5280_vm0, %v5279_v0 }
 0x503   :  { %4400 = vmatprep.subr.bf16.mxu0 %v5279_v0 }
 0x504   :  { %v1122_v41 = vpop.permute.xlu1 %1121  ;;  %v1347_v48 = vpop.permute.xlu0 %1346 }
 0x508   :  { %v1257_v43 = vpop.permute.xlu1 %1256  ;;  %v1392_v49 = vpop.permute.xlu0 %1391 }
 0x509   :  { %4373 = vmatmul.mubr.msk.bf16.vlgmr.msra.gmra.mrb[16].mxu1 %vm807_vm3, %v1032_v40 }
 0x50a   :  { %4389 = vmatpush3.bf16.msra.mxu1 %v5613_v54  ;;  %4390 = vmatprep.mubr.msk.bf16.mxu1 %vm5280_vm0, %v5279_v0 }
 0x50b   :  { %4394 = vmatprep.subr.bf16.mxu1 %v5279_v0 }
 0x50c   :  { %v1302_v47 = vpop.permute.xlu1 %1301  ;;  %v1721_v51 = vpop.permute.xlu0 %1720 }
 0x50d   :  { %4385 = vmatmul.mubr.msk.bf16.vlgmr.msra.gmra.mrb[20].mxu0 %vm807_vm3, %v1122_v41 }
 0x50e   :  { %4401 = vmatpush3.bf16.msra.mxu0 %v5613_v54  ;;  %4402 = vmatprep.mubr.msk.bf16.mxu0 %vm5280_vm0, %v5279_v0 }
 0x50f   :  { %4406 = vmatprep.subr.bf16.mxu0 %v5279_v0 }
 0x510   :  { %v1675_v50 = vpop.permute.xlu1 %1674 }
 0x511   :  { %4391 = vmatmul.mubr.msk.bf16.vlgmr.msra.gmra.mrb[20].mxu1 %vm807_vm3, %v1167_v42  ;;  %v4915_v42 = vld [vmem:[#allocation8] sm:$0x1f]  }
 0x512   :  { %4395 = vmatpush3.bf16.msra.mxu1 %v5613_v54  ;;  %4396 = vmatprep.mubr.msk.bf16.mxu1 %vm5280_vm0, %v5279_v0 }
 0x513   :  { %4412 = vmatprep.subr.bf16.mxu1 %v5279_v0 }
 0x514   :  { %v1859_v52 = vpop.permute.xlu1 %1858 }
 0x515   :  { %4403 = vmatmul.mubr.msk.bf16.vlgmr.msra.gmra.mrb[24].mxu0 %vm807_vm3, %v1257_v43  ;;  %v2171_v43 = vld [vmem:[#allocation14] sm:$0x3] }
 0x516   :  { %4407 = vmatpush3.bf16.msra.mxu0 %v5613_v54  ;;  %4408 = vmatprep.mubr.msk.bf16.mxu0 %vm5280_vm0, %v5279_v0 }
 0x517   :  { %4424 = vmatprep.subr.bf16.mxu0 %v5279_v0 }
 0x51d   :  { %4397 = vmatmul.mubr.msk.bf16.vlgmr.msra.gmra.mrb[20].mxu1 %vm807_vm3, %v1212_v45  ;;  %v5794_v45 = vsel %vm2126_vm11, %v2171_v43, 0 }
 0x51e   :  { %4413 = vmatpush3.bf16.msra.mxu1 %v5613_v54  ;;  %4414 = vmatprep.mubr.msk.bf16.mxu1 %vm5280_vm0, %v5279_v0 }
 0x51f   :  { %4418 = vmatprep.subr.bf16.mxu1 %v5279_v0 }
 0x521   :  { %4409 = vmatmul.mubr.msk.bf16.vlgmr.msra.gmra.mrb[24].mxu0 %vm807_vm3, %v1302_v47 }
 0x522   :  { %4425 = vmatpush3.bf16.msra.mxu0 %v5703_v46  ;;  %4426 = vmatprep.mubr.msk.bf16.mxu0 %vm5280_vm0, %v5279_v0 }
 0x523   :  { %4430 = vmatprep.subr.bf16.mxu0 %v5279_v0 }
 0x525   :  { %4415 = vmatmul.mubr.msk.bf16.vlgmr.msra.gmra.mrb[24].mxu1 %vm807_vm3, %v1347_v48 }
 0x526   :  { %4419 = vmatpush3.bf16.msra.mxu1 %v5613_v54  ;;  %4420 = vmatprep.mubr.msk.bf16.mxu1 %vm5280_vm0, %v5279_v0 }
 0x527   :  { %4436 = vmatprep.subr.bf16.mxu1 %v5279_v0 }
 0x529   :  { %4427 = vmatmul.mubr.msk.bf16.vlgmr.msra.gmra.mrb[28].mxu0 %vm807_vm3, %v5650_v37 }
 0x52a   :  { %4431 = vmatpush3.bf16.msra.mxu0 %v5703_v46  ;;  %4432 = vmatprep.mubr.msk.bf16.mxu0 %vm5280_vm0, %v5279_v0 }
 0x52b   :  { %4448 = vmatprep.subr.bf16.mxu0 %v5279_v0 }
 0x531   :  { %4421 = vmatmul.mubr.msk.bf16.vlgmr.msra.gmra.mrb[24].mxu1 %vm807_vm3, %v1392_v49 }
 0x532   :  { %4437 = vmatpush3.bf16.msra.mxu1 %v5703_v46  ;;  %4438 = vmatprep.mubr.msk.bf16.mxu1 %vm5280_vm0, %v5279_v0 }
 0x533   :  { %4442 = vmatprep.subr.bf16.mxu1 %v5279_v0 }
 0x535   :  { %4433 = vmatmul.mubr.msk.bf16.vlgmr.msra.gmra.mrb[28].mxu0 %vm807_vm3, %v5638_v33 }
 0x536   :  { %4449 = vmatpush3.bf16.msra.mxu0 %v5703_v46  ;;  %4450 = vmatprep.mubr.msk.bf16.mxu0 %vm5280_vm0, %v5279_v0 }
 0x537   :  { %4454 = vmatprep.subr.bf16.mxu0 %v5279_v0 }
 0x53d   :  { %4451 = vmatmul.mubr.msk.bf16.vlgmr.msra.gmra.mrb[32].mxu0 %vm807_vm3, %v1675_v50 }
 0x53e   :  { %4455 = vmatpush3.bf16.msra.mxu0 %v5703_v46  ;;  %4456 = vmatprep.mubr.msk.bf16.mxu0 %vm5280_vm0, %v5279_v0 }
 0x53f   :  { %4472 = vmatprep.subr.bf16.mxu0 %v5279_v0 }
 0x549   :  { %4457 = vmatmul.mubr.msk.bf16.vlgmr.msra.gmra.mrb[32].mxu0 %vm807_vm3, %v1721_v51 }
 0x54a   :  { %4473 = vmatpush3.bf16.msra.mxu0 %v5703_v46  ;;  %4474 = vmatprep.mubr.msk.bf16.mxu0 %vm5280_vm0, %v5279_v0 }
 0x54b   :  { %4478 = vmatprep.subr.bf16.mxu0 %v5279_v0 }
 0x551   :  { %4475 = vmatmul.mubr.msk.bf16.vlgmr.msra.gmra.mrb[36].mxu0 %vm807_vm3, %v1859_v52 }
 0x552   :  { %4479 = vmatpush3.bf16.msra.mxu0 %v5703_v46  ;;  %4480 = vmatprep.mubr.msk.bf16.mxu0 %vm5280_vm0, %v5279_v0 }
 0x553   :  { %4496 = vmatprep.subr.bf16.mxu0 %v5279_v0 }
 0x56a   :  { %v978_v53 = vpop.f32.mrb[16].mxu0 }
 0x56b   :  { %v4362_v54 = vpop.f32.mrb[17].mxu0 }
 0x56c   :  { %v981_v55 = vpop.f32.mrb[18].mxu0 }
 0x56d   :  { %v4363_v56 = vpop.f32.mrb[19].mxu0 }
 0x5dc   :  { %v1070_v57 = vpop.f32.mrb[16].mxu1 }
 0x5dd   :  { %1437 = vrot.lane.b32.xlu0 %v1070_v57, %s5268_s21  ;;  %v4374_v58 = vpop.f32.mrb[17].mxu1 }
 0x5de   :  { %v1073_v59 = vpop.f32.mrb[18].mxu1 }
 0x5df   :  { %v4375_v60 = vpop.f32.mrb[19].mxu1 }
 0x5e0   :  { %v1160_v61 = vpop.f32.mrb[20].mxu0 }
 0x5e1   :  { %1441 = vrot.lane.b32.xlu1 %v1160_v61, %s5273_s22  ;;  %v4386_v62 = vpop.f32.mrb[21].mxu0 }
 0x5e2   :  { %v1163_v63 = vpop.f32.mrb[22].mxu0 }
 0x5e3   :  { %v4387_v1 = vpop.f32.mrb[23].mxu0 }
 0x5f0   :  { %v1250_v2 = vpop.f32.mrb[20].mxu1 }
 0x5f1   :  { %1445 = vrot.lane.b32.xlu0 %v1250_v2, %s5292_s0  ;;  %v4398_v3 = vpop.f32.mrb[21].mxu1 }
 0x5f2   :  { %v1253_v4 = vpop.f32.mrb[22].mxu1 }
 0x5f3   :  { %v4399_v5 = vpop.f32.mrb[23].mxu1 }
 0x5f4   :  { %v1340_v6 = vpop.f32.mrb[24].mxu0 }
 0x5f5   :  { %1449 = vrot.lane.b32.xlu1 %v1340_v6, %s5285_s2  ;;  %v4410_v7 = vpop.f32.mrb[25].mxu0 }
 0x5f6   :  { %v1343_v8 = vpop.f32.mrb[26].mxu0 }
 0x5f7   :  { %v4411_v9 = vpop.f32.mrb[27].mxu0 }
 0x5f9   :  { %1904 = vrot.lane.b32.xlu1 %v5638_v33, %s5281_s10 }
 0x5fd   :  { %1628 = vrot.lane.b32.xlu1 %v5638_v33, %s5289_s6 }
 0x601   :  { %1812 = vrot.lane.b32.xlu1 %v5638_v33, %s5290_s16 }
 0x604   :  { %v1430_v12 = vpop.f32.mrb[24].mxu1 }
 0x605   :  { %1453 = vrot.lane.b32.xlu0 %v1430_v12, %s5293_s29  ;;  %v4422_v13 = vpop.f32.mrb[25].mxu1  ;;  %1996 = vrot.lane.b32.xlu1 %v5638_v33, %s5291_s17 }
 0x606   :  { %v1433_v14 = vpop.f32.mrb[26].mxu1 }
 0x607   :  { %v4423_v15 = vpop.f32.mrb[27].mxu1 }
 0x608   :  { %v5761_v16 = vpop.f32.mrb[28].mxu0 }
 0x609   :  { %1582 = vrot.lane.b32.xlu0 %v5650_v37, %s5289_s6  ;;  %v4434_v17 = vpop.f32.mrb[29].mxu0 }
 0x60a   :  { %v5765_v18 = vpop.f32.mrb[30].mxu0 }
 0x60b   :  { %v4435_v19 = vpop.f32.mrb[31].mxu0 }
 0x60d   :  { %1766 = vrot.lane.b32.xlu0 %v5650_v37, %s5290_s16 }
 0x611   :  { %1950 = vrot.lane.b32.xlu0 %v5650_v37, %s5291_s17 }
 0x61c   :  { %v5771_v20 = vpop.f32.mrb[32].mxu0 }
 0x61d   :  { %v4458_v21 = vpop.f32.mrb[33].mxu0 }
 0x61e   :  { %v5773_v22 = vpop.f32.mrb[34].mxu0 }
 0x61f   :  { %v4459_v23 = vpop.f32.mrb[35].mxu0 }
 0x64f   :  { %v1438_v27 = vpop.permute.xlu0 %1437 }
 0x650   :  { %v1457_v29 = vsel %vm1456_vm8, %v978_v53, %v1438_v27 }
 0x653   :  { %v1442_v24 = vpop.permute.xlu1 %1441 }
 0x654   :  { %v1458_v30 = vsel %vm807_vm3, %v1457_v29, %v1442_v24 }
 0x663   :  { %v1446_v28 = vpop.permute.xlu0 %1445 }
 0x664   :  { %v1460_v31 = vsel %vm1459_vm9, %v1458_v30, %v1446_v28 }
 0x667   :  { %v1450_v25 = vpop.permute.xlu1 %1449 }
 0x668   :  { %v1461_v32 = vsel %vm193_vm1, %v1460_v31, %v1450_v25  ;;  %v2750_v31 = vld [vmem:[#allocation17] sm:$0x3] }
 0x66b   :  { %v1905_v26 = vpop.permute.xlu1 %1904 }
 0x66c   :  { %4481 = vmatmul.mubr.msk.bf16.vlgmr.msra.gmra.mrb[36].mxu0 %vm807_vm3, %v1905_v26 }
 0x66d   :  { %4498 = vmatprep.mubr.msk.bf16.mxu0 %vm5280_vm0, %v5279_v0 }
 0x66f   :  { %v1629_v44 = vpop.permute.xlu1 %1628 }
 0x673   :  { %v1813_v48 = vpop.permute.xlu1 %1812 }
 0x677   :  { %v1454_v33 = vpop.permute.xlu0 %1453  ;;  %v1997_v50 = vpop.permute.xlu1 %1996 }
 0x678   :  { %v1463_v34 = vsel %vm1462_vm10, %v1461_v32, %v1454_v33  ;;  %v5907_v33 = vsel %vm2126_vm11, %v2750_v31, 0 }
 0x679   :  { %v1464_v35 = vadd.f32 0.5, %v1463_v34 }
 0x67b   :  { %v1465_v36 = vfloor.f32 %v1464_v35  ;;  %v1583_v37 = vpop.permute.xlu0 %1582 }
 0x67c   :  { %4439 = vmatmul.mubr.msk.bf16.vlgmr.msra.gmra.mrb[28].mxu1 %vm807_vm3, %v1583_v37 }
 0x67d   :  { %v1466_v38 = vmax.f32 %v1465_v36, 0.0  ;;  %4443 = vmatpush3.bf16.msra.mxu1 %v5703_v46  ;;  %4444 = vmatprep.mubr.msk.bf16.mxu1 %vm5280_vm0, %v5279_v0 }
 0x67e   :  { %4460 = vmatprep.subr.bf16.mxu1 %v5279_v0 }
 0x67f   :  { %v1467_v39 = vmin.f32 %v1466_v38, 255.0  ;;  %v1767_v47 = vpop.permute.xlu0 %1766 }
 0x681   :  { %v5788_v40 = vpack.c.bf16 %v1467_v39, %v1467_v39 }
 0x683   :  { %v2128_v41 = vsel %vm2126_vm11, %v5788_v40, 0  ;;  %v1951_v49 = vpop.permute.xlu0 %1950  ;;  %vm2089_vm11 = vcmask 523264  }
 0x684   :  { %4497 = vmatpush3.bf16.msra.mxu0 %v2128_v41 }
 0x685   :  { %4514 = vmatprep.subr.bf16.mxu0 %v5279_v0 }
 0x687   :  { %4499 = vmatmul.mubr.msk.bf16.vlgmr.msra.gmra.mrb[40].mxu0 %vm1456_vm8, %v4915_v42 }
 0x688   :  { %4445 = vmatmul.mubr.msk.bf16.vlgmr.msra.gmra.mrb[28].mxu1 %vm807_vm3, %v1629_v44  ;;  %4515 = vmatpush3.bf16.msra.mxu0 %v5794_v45 }
 0x689   :  { %4461 = vmatpush3.bf16.msra.mxu1 %v5703_v46  ;;  %4462 = vmatprep.mubr.msk.bf16.mxu1 %vm5280_vm0, %v5279_v0 }
 0x68a   :  { %4466 = vmatprep.subr.bf16.mxu1 %v5279_v0  ;;  %4516 = vmatprep.mubr.msk.bf16.mxu0 %vm5280_vm0, %v5279_v0 }
 0x68b   :  { %4520 = vmatprep.subr.bf16.mxu0 %v5279_v0 }
 0x690   :  { %4463 = vmatmul.mubr.msk.bf16.vlgmr.msra.gmra.mrb[32].mxu1 %vm807_vm3, %v1767_v47 }
 0x691   :  { %4467 = vmatpush3.bf16.msra.mxu1 %v5703_v46  ;;  %4468 = vmatprep.mubr.msk.bf16.mxu1 %vm5280_vm0, %v5279_v0 }
 0x692   :  { %4484 = vmatprep.subr.bf16.mxu1 %v5279_v0 }
 0x69c   :  { %4469 = vmatmul.mubr.msk.bf16.vlgmr.msra.gmra.mrb[32].mxu1 %vm807_vm3, %v1813_v48 }
 0x69d   :  { %4485 = vmatpush3.bf16.msra.mxu1 %v5703_v46  ;;  %4486 = vmatprep.mubr.msk.bf16.mxu1 %vm5280_vm0, %v5279_v0 }
 0x69e   :  { %4490 = vmatprep.subr.bf16.mxu1 %v5279_v0 }
 0x6a4   :  { %4487 = vmatmul.mubr.msk.bf16.vlgmr.msra.gmra.mrb[36].mxu1 %vm807_vm3, %v1951_v49 }
 0x6a5   :  { %4491 = vmatpush3.bf16.msra.mxu1 %v5703_v46  ;;  %4492 = vmatprep.mubr.msk.bf16.mxu1 %vm5280_vm0, %v5279_v0 }
 0x6a6   :  { %4502 = vmatprep.subr.bf16.mxu1 %v5279_v0 }
 0x6b0   :  { %4493 = vmatmul.mubr.msk.bf16.vlgmr.msra.gmra.mrb[36].mxu1 %vm807_vm3, %v1997_v50 }
 0x6b1   :  { %4503 = vmatpush3.bf16.msra.mxu1 %v5794_v45  ;;  %4504 = vmatprep.mubr.msk.bf16.mxu1 %vm5280_vm0, %v5279_v0 }
 0x6b2   :  { %4508 = vmatprep.subr.bf16.mxu1 %v5279_v0 }
 0x73f   :  { %v5826_v51 = vpop.f32.mrb[36].mxu0 }
 0x740   :  { %v4482_v52 = vpop.f32.mrb[37].mxu0 }
 0x741   :  { %v5828_v53 = vpop.f32.mrb[38].mxu0 }
 0x742   :  { %v4483_v46 = vpop.f32.mrb[39].mxu0 }
 0x75a   :  { %v2164_v54 = vpop.f32.mrb[40].mxu0 }
 0x75b   :  { %v2172_v55 = vpack.c.bf16 %v2164_v54, %v2164_v54  ;;  %v5830_v56 = vpop.f32.mrb[28].mxu1  ;;  %v4500_v57 = vpop.f32.mrb[41].mxu0 }
 0x75c   :  { %v4446_v58 = vpop.f32.mrb[29].mxu1  ;;  %v2167_v59 = vpop.f32.mrb[42].mxu0 }
 0x75d   :  { %v2173_v60 = vunpack.c.l.bf16 %v2172_v55  ;;  %v2751_v61 = vpack.c.bf16 %v2167_v59, %v2164_v54  ;;  %v5832_v62 = vpop.f32.mrb[30].mxu1  ;;  %2312 = vrot.lane.b32.xlu1 %v2172_v55, %s5294_s18  ;;  %v4501_v63 = vpop.f32.mrb[43].mxu0 }
 0x75e   :  { %v4447_v1 = vpop.f32.mrb[31].mxu1 }
 0x75f   :  { %v2174_v2 = vsub.f32 %v2164_v54, %v2173_v60  ;;  %v2752_v3 = vunpack.c.l.bf16 %v2751_v61  ;;  %v2753_v4 = vunpack.c.h.bf16 %v2751_v61  ;;  %v5851_v13 = vrot.slane %v2751_v61, 1 }
 0x761   :  { %v2175_v5 = vpack.c.bf16 %v2174_v2, %v2174_v2  ;;  %v2754_v6 = vsub.f32 %v2164_v54, %v2752_v3  ;;  %v2755_v7 = vsub.f32 %v2167_v59, %v2753_v4 }
 0x763   :  { %v2756_v8 = vpack.c.bf16 %v2755_v7, %v2754_v6  ;;  %2447 = vrot.lane.b32.xlu1 %v2175_v5, %s5295_s3  ;;  %2266 = vrot.lane.b32.xlu0 %v2175_v5, %s5294_s18 }
 0x764   :  { %4505 = vmatmul.mubr.msk.bf16.vlgmr.msra.gmra.mrb[40].mxu1 %vm1456_vm8, %v2175_v5 }
 0x765   :  { %4509 = vmatpush3.bf16.msra.mxu1 %v5794_v45  ;;  %4510 = vmatprep.mubr.msk.bf16.mxu1 %vm5280_vm0, %v5279_v0  ;;  %v5862_v17 = vrot.slane %v2756_v8, 1 }
 0x766   :  { %4526 = vmatprep.subr.bf16.mxu1 %v5279_v0 }
 0x767   :  { %2492 = vrot.lane.b32.xlu1 %v2172_v55, %s5295_s3  ;;  %2357 = vrot.lane.b32.xlu0 %v2175_v5, %s5289_s6 }
 0x76b   :  { %2627 = vrot.lane.b32.xlu1 %v2175_v5, %s5296_s26  ;;  %2402 = vrot.lane.b32.xlu0 %v2172_v55, %s5289_s6 }
 0x76f   :  { %v5846_v9 = vpop.f32.mrb[32].mxu1  ;;  %2672 = vrot.lane.b32.xlu1 %v2172_v55, %s5296_s26  ;;  %2537 = vrot.lane.b32.xlu0 %v2175_v5, %s5282_s25 }
 0x770   :  { %4511 = vmatmul.mubr.msk.bf16.vlgmr.msra.gmra.mrb[40].mxu1 %vm1456_vm8, %v2172_v55  ;;  %v4470_v12 = vpop.f32.mrb[33].mxu1 }
 0x771   :  { %v5853_v14 = vpop.f32.mrb[34].mxu1  ;;  %4527 = vmatpush3.bf16.msra.mxu1 %v5794_v45  ;;  %4528 = vmatprep.mubr.msk.bf16.mxu1 %vm5280_vm0, %v5279_v0 }
 0x772   :  { %v4471_v15 = vpop.f32.mrb[35].mxu1  ;;  %4532 = vmatprep.subr.bf16.mxu1 %v5279_v0 }
 0x773   :  { %2582 = vrot.lane.b32.xlu0 %v2172_v55, %s5282_s25  ;;  %2985 = vrot.lane.b32.xlu1 %v5851_v13, %s5289_s6 }
 0x777   :  { %2940 = vrot.lane.b32.xlu0 %v5862_v17, %s5289_s6 }
 0x77b   :  { %3120 = vrot.lane.b32.xlu0 %v5862_v17, %s5282_s25 }
 0x783   :  { %v5868_v19 = vpop.f32.mrb[36].mxu1 }
 0x784   :  { %v4494_v21 = vpop.f32.mrb[37].mxu1 }
 0x785   :  { %v5870_v23 = vpop.f32.mrb[38].mxu1 }
 0x786   :  { %v4495_v24 = vpop.f32.mrb[39].mxu1 }
 0x7cf   :  { %v2313_v27 = vpop.permute.xlu1 %2312 }
 0x7d5   :  { %v2267_v25 = vpop.permute.xlu0 %2266  ;;  %v2448_v29 = vpop.permute.xlu1 %2447 }
 0x7d6   :  { %4517 = vmatmul.mubr.msk.bf16.vlgmr.msra.gmra.mrb[44].mxu0 %vm1456_vm8, %v2267_v25 }
 0x7d7   :  { %4521 = vmatpush3.bf16.msra.mxu0 %v5794_v45  ;;  %4522 = vmatprep.mubr.msk.bf16.mxu0 %vm5280_vm0, %v5279_v0 }
 0x7d8   :  { %4538 = vmatprep.subr.bf16.mxu0 %v5279_v0 }
 0x7d9   :  { %v2358_v26 = vpop.permute.xlu0 %2357  ;;  %v2493_v32 = vpop.permute.xlu1 %2492 }
 0x7da   :  { %4529 = vmatmul.mubr.msk.bf16.vlgmr.msra.gmra.mrb[44].mxu1 %vm1456_vm8, %v2358_v26 }
 0x7db   :  { %4533 = vmatpush3.bf16.msra.mxu1 %v5794_v45  ;;  %4534 = vmatprep.mubr.msk.bf16.mxu1 %vm5280_vm0, %v5279_v0 }
 0x7dc   :  { %4550 = vmatprep.subr.bf16.mxu1 %v5279_v0 }
 0x7dd   :  { %v2403_v28 = vpop.permute.xlu0 %2402  ;;  %v2628_v35 = vpop.permute.xlu1 %2627 }
 0x7e1   :  { %v2538_v30 = vpop.permute.xlu0 %2537  ;;  %v2673_v36 = vpop.permute.xlu1 %2672 }
 0x7e2   :  { %4523 = vmatmul.mubr.msk.bf16.vlgmr.msra.gmra.mrb[44].mxu0 %vm1456_vm8, %v2313_v27 }
 0x7e3   :  { %4539 = vmatpush3.bf16.msra.mxu0 %v5794_v45  ;;  %4540 = vmatprep.mubr.msk.bf16.mxu0 %vm5280_vm0, %v5279_v0 }
 0x7e4   :  { %4544 = vmatprep.subr.bf16.mxu0 %v5279_v0 }
 0x7e5   :  { %v2583_v34 = vpop.permute.xlu0 %2582  ;;  %v2986_v38 = vpop.permute.xlu1 %2985 }
 0x7e6   :  { %4535 = vmatmul.mubr.msk.bf16.vlgmr.msra.gmra.mrb[44].mxu1 %vm1456_vm8, %v2403_v28 }
 0x7e7   :  { %4551 = vmatpush3.bf16.msra.mxu1 %v5794_v45  ;;  %4552 = vmatprep.mubr.msk.bf16.mxu1 %vm5280_vm0, %v5279_v0 }
 0x7e8   :  { %4556 = vmatprep.subr.bf16.mxu1 %v5279_v0 }
 0x7e9   :  { %v2941_v37 = vpop.permute.xlu0 %2940 }
 0x7ea   :  { %4541 = vmatmul.mubr.msk.bf16.vlgmr.msra.gmra.mrb[48].mxu0 %vm1456_vm8, %v2448_v29 }
 0x7eb   :  { %4545 = vmatpush3.bf16.msra.mxu0 %v5794_v45  ;;  %4546 = vmatprep.mubr.msk.bf16.mxu0 %vm5280_vm0, %v5279_v0 }
 0x7ec   :  { %4562 = vmatprep.subr.bf16.mxu0 %v5279_v0 }
 0x7ed   :  { %v3121_v39 = vpop.permute.xlu0 %3120 }
 0x7ee   :  { %4553 = vmatmul.mubr.msk.bf16.vlgmr.msra.gmra.mrb[48].mxu1 %vm1456_vm8, %v2538_v30 }
 0x7ef   :  { %4557 = vmatpush3.bf16.msra.mxu1 %v5794_v45  ;;  %4558 = vmatprep.mubr.msk.bf16.mxu1 %vm5280_vm0, %v5279_v0 }
 0x7f0   :  { %4574 = vmatprep.subr.bf16.mxu1 %v5279_v0 }
 0x7f6   :  { %4547 = vmatmul.mubr.msk.bf16.vlgmr.msra.gmra.mrb[48].mxu0 %vm1456_vm8, %v2493_v32 }
 0x7f7   :  { %4563 = vmatpush3.bf16.msra.mxu0 %v5794_v45  ;;  %4564 = vmatprep.mubr.msk.bf16.mxu0 %vm5280_vm0, %v5279_v0 }
 0x7f8   :  { %4568 = vmatprep.subr.bf16.mxu0 %v5279_v0 }
 0x7fa   :  { %4559 = vmatmul.mubr.msk.bf16.vlgmr.msra.gmra.mrb[48].mxu1 %vm1456_vm8, %v2583_v34 }
 0x7fb   :  { %4575 = vmatpush3.bf16.msra.mxu1 %v5907_v33  ;;  %4576 = vmatprep.mubr.msk.bf16.mxu1 %vm5280_vm0, %v5279_v0 }
 0x7fc   :  { %4580 = vmatprep.subr.bf16.mxu1 %v5279_v0 }
 0x7fe   :  { %4565 = vmatmul.mubr.msk.bf16.vlgmr.msra.gmra.mrb[52].mxu0 %vm1456_vm8, %v2628_v35 }
 0x7ff   :  { %4569 = vmatpush3.bf16.msra.mxu0 %v5794_v45  ;;  %4570 = vmatprep.mubr.msk.bf16.mxu0 %vm5280_vm0, %v5279_v0 }
 0x800   :  { %4586 = vmatprep.subr.bf16.mxu0 %v5279_v0 }
 0x802   :  { %4577 = vmatmul.mubr.msk.bf16.vlgmr.msra.gmra.mrb[52].mxu1 %vm1456_vm8, %v5862_v17 }
 0x803   :  { %4581 = vmatpush3.bf16.msra.mxu1 %v5907_v33  ;;  %4582 = vmatprep.mubr.msk.bf16.mxu1 %vm5280_vm0, %v5279_v0 }
 0x804   :  { %4598 = vmatprep.subr.bf16.mxu1 %v5279_v0 }
 0x80a   :  { %4571 = vmatmul.mubr.msk.bf16.vlgmr.msra.gmra.mrb[52].mxu0 %vm1456_vm8, %v2673_v36 }
 0x80b   :  { %4587 = vmatpush3.bf16.msra.mxu0 %v5907_v33  ;;  %4588 = vmatprep.mubr.msk.bf16.mxu0 %vm5280_vm0, %v5279_v0 }
 0x80c   :  { %4592 = vmatprep.subr.bf16.mxu0 %v5279_v0 }
 0x80e   :  { %4583 = vmatmul.mubr.msk.bf16.vlgmr.msra.gmra.mrb[52].mxu1 %vm1456_vm8, %v5851_v13 }
 0x80f   :  { %4599 = vmatpush3.bf16.msra.mxu1 %v5907_v33  ;;  %4600 = vmatprep.mubr.msk.bf16.mxu1 %vm5280_vm0, %v5279_v0 }
 0x810   :  { %4604 = vmatprep.subr.bf16.mxu1 %v5279_v0 }
 0x816   :  { %4601 = vmatmul.mubr.msk.bf16.vlgmr.msra.gmra.mrb[56].mxu1 %vm1456_vm8, %v2941_v37 }
 0x817   :  { %4605 = vmatpush3.bf16.msra.mxu1 %v5907_v33  ;;  %4606 = vmatprep.mubr.msk.bf16.mxu1 %vm5280_vm0, %v5279_v0 }
 0x818   :  { %4622 = vmatprep.subr.bf16.mxu1 %v5279_v0 }
 0x822   :  { %4607 = vmatmul.mubr.msk.bf16.vlgmr.msra.gmra.mrb[56].mxu1 %vm1456_vm8, %v2986_v38 }
 0x823   :  { %4623 = vmatpush3.bf16.msra.mxu1 %v5907_v33  ;;  %4624 = vmatprep.mubr.msk.bf16.mxu1 %vm5280_vm0, %v5279_v0 }
 0x824   :  { %4628 = vmatprep.subr.bf16.mxu1 %v5279_v0 }
 0x82a   :  { %4625 = vmatmul.mubr.msk.bf16.vlgmr.msra.gmra.mrb[60].mxu1 %vm1456_vm8, %v3121_v39 }
 0x82b   :  { %4629 = vmatpush3.bf16.msra.mxu1 %v5907_v33  ;;  %4630 = vmatprep.mubr.msk.bf16.mxu1 %vm5280_vm0, %v5279_v0 }
 0x82c   :  { %4646 = vmatprep.subr.bf16.mxu1 %v5279_v0 }
 0x843   :  { %v2259_v41 = vpop.f32.mrb[40].mxu1 }
 0x844   :  { %v4512_v42 = vpop.f32.mrb[41].mxu1 }
 0x845   :  { %v2262_v43 = vpop.f32.mrb[42].mxu1 }
 0x846   :  { %v4513_v44 = vpop.f32.mrb[43].mxu1 }
 0x8b5   :  { %v2351_v45 = vpop.f32.mrb[44].mxu0 }
 0x8b6   :  { %2718 = vrot.lane.b32.xlu1 %v2351_v45, %s5297_s19  ;;  %v4524_v47 = vpop.f32.mrb[45].mxu0  ;;  %v3384_v45 = vld [vmem:[#allocation19] sm:$0x1] }
 0x8b7   :  { %v2354_v48 = vpop.f32.mrb[46].mxu0  ;;  %v3336_v47 = vld [vmem:[#allocation10] sm:$0x3] }
 0x8b8   :  { %v4525_v49 = vpop.f32.mrb[47].mxu0 }
 0x8b9   :  { %v2441_v50 = vpop.f32.mrb[44].mxu1 }
 0x8ba   :  { %v4536_v52 = vpop.f32.mrb[45].mxu1  ;;  %2722 = vrot.lane.b32.xlu0 %v2441_v50, %s5268_s21  ;;  %v5984_v50 = vsel %vm3340_vm15, %v3384_v45, 0 }
 0x8bb   :  { %v2444_v46 = vpop.f32.mrb[46].mxu1 }
 0x8bc   :  { %v4537_v54 = vpop.f32.mrb[47].mxu1 }
 0x8c9   :  { %v2531_v55 = vpop.f32.mrb[48].mxu0 }
 0x8ca   :  { %2726 = vrot.lane.b32.xlu1 %v2531_v55, %s5298_s4  ;;  %v4548_v57 = vpop.f32.mrb[49].mxu0 }
 0x8cb   :  { %v2534_v58 = vpop.f32.mrb[50].mxu0 }
 0x8cc   :  { %v4549_v59 = vpop.f32.mrb[51].mxu0 }
 0x8cd   :  { %v2621_v60 = vpop.f32.mrb[48].mxu1 }
 0x8ce   :  { %v4560_v61 = vpop.f32.mrb[49].mxu1  ;;  %2730 = vrot.lane.b32.xlu0 %v2621_v60, %s5273_s22 }
 0x8cf   :  { %v2624_v63 = vpop.f32.mrb[50].mxu1 }
 0x8d0   :  { %v4561_v1 = vpop.f32.mrb[51].mxu1 }
 0x8d2   :  { %3165 = vrot.lane.b32.xlu0 %v5851_v13, %s5282_s25 }
 0x8d6   :  { %2895 = vrot.lane.b32.xlu0 %v5851_v13, %s5294_s18 }
 0x8da   :  { %3075 = vrot.lane.b32.xlu0 %v5851_v13, %s5295_s3 }
 0x8dd   :  { %v2711_v2 = vpop.f32.mrb[52].mxu0 }
 0x8de   :  { %3255 = vrot.lane.b32.xlu0 %v5851_v13, %s5296_s26  ;;  %2734 = vrot.lane.b32.xlu1 %v2711_v2, %s5299_s7  ;;  %v4572_v3 = vpop.f32.mrb[53].mxu0 }
 0x8df   :  { %v2714_v4 = vpop.f32.mrb[54].mxu0 }
 0x8e0   :  { %v4573_v5 = vpop.f32.mrb[55].mxu0 }
 0x8e1   :  { %v5962_v6 = vpop.f32.mrb[52].mxu1 }
 0x8e2   :  { %v4584_v7 = vpop.f32.mrb[53].mxu1  ;;  %2850 = vrot.lane.b32.xlu1 %v5862_v17, %s5294_s18 }
 0x8e3   :  { %v2847_v8 = vpop.f32.mrb[54].mxu1 }
 0x8e4   :  { %v4585_v12 = vpop.f32.mrb[55].mxu1 }
 0x8e6   :  { %3030 = vrot.lane.b32.xlu1 %v5862_v17, %s5295_s3 }
 0x8ea   :  { %3210 = vrot.lane.b32.xlu1 %v5862_v17, %s5296_s26 }
 0x8f5   :  { %v5970_v13 = vpop.f32.mrb[56].mxu1 }
 0x8f6   :  { %v4608_v15 = vpop.f32.mrb[57].mxu1 }
 0x8f7   :  { %v3027_v21 = vpop.f32.mrb[58].mxu1 }
 0x8f8   :  { %v4609_v24 = vpop.f32.mrb[59].mxu1 }
 0x928   :  { %v2719_v28 = vpop.permute.xlu1 %2718 }
 0x929   :  { %v2738_v30 = vsel %vm2737_vm12, %v2259_v41, %v2719_v28 }
 0x92c   :  { %v2723_v25 = vpop.permute.xlu0 %2722 }
 0x92d   :  { %v2739_v17 = vsel %vm1456_vm8, %v2738_v30, %v2723_v25 }
 0x93c   :  { %v2727_v29 = vpop.permute.xlu1 %2726 }
 0x93d   :  { %v2741_v31 = vsel %vm2740_vm13, %v2739_v17, %v2727_v29 }
 0x940   :  { %v2731_v26 = vpop.permute.xlu0 %2730 }
 0x941   :  { %v2742_v32 = vsel %vm807_vm3, %v2741_v31, %v2731_v26 }
 0x944   :  { %v3166_v27 = vpop.permute.xlu0 %3165 }
 0x945   :  { %4631 = vmatmul.mubr.msk.bf16.vlgmr.msra.gmra.mrb[60].mxu1 %vm1456_vm8, %v3166_v27 }
 0x946   :  { %4648 = vmatprep.mubr.msk.bf16.mxu1 %vm5280_vm0, %v5279_v0 }
 0x948   :  { %v2896_v49 = vpop.permute.xlu0 %2895 }
 0x94c   :  { %v3076_v46 = vpop.permute.xlu0 %3075 }
 0x950   :  { %v2735_v34 = vpop.permute.xlu1 %2734  ;;  %v3256_v55 = vpop.permute.xlu0 %3255 }
 0x951   :  { %v2744_v35 = vsel %vm2743_vm14, %v2742_v32, %v2735_v34 }
 0x952   :  { %v2745_v36 = vadd.f32 0.5, %v2744_v35 }
 0x954   :  { %v2746_v37 = vfloor.f32 %v2745_v36  ;;  %v2851_v38 = vpop.permute.xlu1 %2850 }
 0x955   :  { %4589 = vmatmul.mubr.msk.bf16.vlgmr.msra.gmra.mrb[56].mxu0 %vm1456_vm8, %v2851_v38 }
 0x956   :  { %v2747_v39 = vmax.f32 %v2746_v37, 0.0  ;;  %4593 = vmatpush3.bf16.msra.mxu0 %v5907_v33  ;;  %4594 = vmatprep.mubr.msk.bf16.mxu0 %vm5280_vm0, %v5279_v0 }
 0x957   :  { %4610 = vmatprep.subr.bf16.mxu0 %v5279_v0 }
 0x958   :  { %v2748_v41 = vmin.f32 %v2747_v39, 255.0  ;;  %v3031_v52 = vpop.permute.xlu1 %3030 }
 0x95a   :  { %v2749_v42 = vpack.c.bf16 %v2748_v41, %v2748_v41 }
 0x95c   :  { %v3967_v43 = vunpack.c.l.bf16 %v2749_v42  ;;  %v3342_v44 = vsel %vm3340_vm15, %v2749_v42, 0  ;;  %v3211_v54 = vpop.permute.xlu1 %3210 }
 0x95d   :  { %4647 = vmatpush3.bf16.msra.mxu1 %v3342_v44 }
 0x95e   :  { %4664 = vmatprep.subr.bf16.mxu1 %v5279_v0  ;;  %v3968_v48 = vmul.f32 0.003921569, %v3967_v43 }
 0x960   :  { %4649 = vmatmul.mubr.msk.bf16.vlgmr.msra.gmra.mrb[64].mxu1 %vm2737_vm12, %v3336_v47  ;;  %3970 = vst.msk [vmem:[#allocation24] sm:$0x3] %vm3969_vm2, %v3968_v48 }
 0x961   :  { %4595 = vmatmul.mubr.msk.bf16.vlgmr.msra.gmra.mrb[56].mxu0 %vm1456_vm8, %v2896_v49  ;;  %4665 = vmatpush3.bf16.msra.mxu1 %v5984_v50 }
 0x962   :  { %4611 = vmatpush3.bf16.msra.mxu0 %v5907_v33  ;;  %4612 = vmatprep.mubr.msk.bf16.mxu0 %vm5280_vm0, %v5279_v0 }
 0x963   :  { %4616 = vmatprep.subr.bf16.mxu0 %v5279_v0  ;;  %4666 = vmatprep.mubr.msk.bf16.mxu1 %vm5280_vm0, %v5279_v0 }
 0x964   :  { %4670 = vmatprep.subr.bf16.mxu1 %v5279_v0 }
 0x969   :  { %4613 = vmatmul.mubr.msk.bf16.vlgmr.msra.gmra.mrb[60].mxu0 %vm1456_vm8, %v3031_v52 }
 0x96a   :  { %4617 = vmatpush3.bf16.msra.mxu0 %v5907_v33  ;;  %4618 = vmatprep.mubr.msk.bf16.mxu0 %vm5280_vm0, %v5279_v0 }
 0x96b   :  { %4634 = vmatprep.subr.bf16.mxu0 %v5279_v0 }
 0x975   :  { %4619 = vmatmul.mubr.msk.bf16.vlgmr.msra.gmra.mrb[60].mxu0 %vm1456_vm8, %v3076_v46 }
 0x976   :  { %4635 = vmatpush3.bf16.msra.mxu0 %v5907_v33  ;;  %4636 = vmatprep.mubr.msk.bf16.mxu0 %vm5280_vm0, %v5279_v0 }
 0x977   :  { %4640 = vmatprep.subr.bf16.mxu0 %v5279_v0 }
 0x97d   :  { %4637 = vmatmul.mubr.msk.bf16.vlgmr.msra.gmra.mrb[64].mxu0 %vm1456_vm8, %v3211_v54 }
 0x97e   :  { %4641 = vmatpush3.bf16.msra.mxu0 %v5907_v33  ;;  %4642 = vmatprep.mubr.msk.bf16.mxu0 %vm5280_vm0, %v5279_v0 }
 0x97f   :  { %4652 = vmatprep.subr.bf16.mxu0 %v5279_v0 }
 0x989   :  { %4643 = vmatmul.mubr.msk.bf16.vlgmr.msra.gmra.mrb[64].mxu0 %vm1456_vm8, %v3256_v55 }
 0x98a   :  { %4653 = vmatpush3.bf16.msra.mxu0 %v5984_v50  ;;  %4654 = vmatprep.mubr.msk.bf16.mxu0 %vm5280_vm0, %v5279_v0 }
 0x98b   :  { %4658 = vmatprep.subr.bf16.mxu0 %v5279_v0 }
 0xa18   :  { %v3204_v57 = vpop.f32.mrb[60].mxu1 }
 0xa19   :  { %v4632_v58 = vpop.f32.mrb[61].mxu1 }
 0xa1a   :  { %v3207_v59 = vpop.f32.mrb[62].mxu1 }
 0xa1b   :  { %v4633_v60 = vpop.f32.mrb[63].mxu1 }
 0xa33   :  { %v3378_v33 = vpop.f32.mrb[64].mxu1 }
 0xa34   :  { %v3385_v61 = vpack.c.bf16 %v3378_v33, %v3378_v33  ;;  %v2934_v63 = vpop.f32.mrb[56].mxu0  ;;  %v4650_v1 = vpop.f32.mrb[65].mxu1 }
 0xa35   :  { %v4596_v2 = vpop.f32.mrb[57].mxu0  ;;  %v3381_v3 = vpop.f32.mrb[66].mxu1 }
 0xa36   :  { %v3386_v4 = vunpack.c.l.bf16 %v3385_v61  ;;  %v2937_v5 = vpop.f32.mrb[58].mxu0  ;;  %3525 = vrot.lane.b32.xlu0 %v3385_v61, %s5300_s1  ;;  %v4651_v7 = vpop.f32.mrb[67].mxu1 }
 0xa37   :  { %v4597_v8 = vpop.f32.mrb[59].mxu0 }
 0xa38   :  { %v3387_v12 = vsub.f32 %v3378_v33, %v3386_v4 }
 0xa3a   :  { %v3388_v15 = vpack.c.bf16 %v3387_v12, %v3387_v12 }
 0xa3c   :  { %3660 = vrot.lane.b32.xlu0 %v3388_v15, %s5301_s8  ;;  %3479 = vrot.lane.b32.xlu1 %v3388_v15, %s5300_s1 }
 0xa3d   :  { %4655 = vmatmul.mubr.msk.bf16.vlgmr.msra.gmra.mrb[68].mxu0 %vm2737_vm12, %v3388_v15 }
 0xa3e   :  { %4659 = vmatpush3.bf16.msra.mxu0 %v5984_v50  ;;  %4660 = vmatprep.mubr.msk.bf16.mxu0 %vm5280_vm0, %v5279_v0 }
 0xa3f   :  { %4676 = vmatprep.subr.bf16.mxu0 %v5279_v0 }
 0xa40   :  { %3705 = vrot.lane.b32.xlu0 %v3385_v61, %s5301_s8  ;;  %3570 = vrot.lane.b32.xlu1 %v3388_v15, %s5294_s18 }
 0xa44   :  { %3840 = vrot.lane.b32.xlu0 %v3388_v15, %s5302_s28  ;;  %3615 = vrot.lane.b32.xlu1 %v3385_v61, %s5294_s18 }
 0xa48   :  { %3885 = vrot.lane.b32.xlu0 %v3385_v61, %s5302_s28  ;;  %3750 = vrot.lane.b32.xlu1 %v3388_v15, %s5289_s6  ;;  %v3114_v21 = vpop.f32.mrb[60].mxu0 }
 0xa49   :  { %4661 = vmatmul.mubr.msk.bf16.vlgmr.msra.gmra.mrb[68].mxu0 %vm2737_vm12, %v3385_v61  ;;  %v4620_v24 = vpop.f32.mrb[61].mxu0 }
 0xa4a   :  { %v3117_v25 = vpop.f32.mrb[62].mxu0  ;;  %4677 = vmatpush3.bf16.msra.mxu0 %v5984_v50  ;;  %4678 = vmatprep.mubr.msk.bf16.mxu0 %vm5280_vm0, %v5279_v0 }
 0xa4b   :  { %v4621_v26 = vpop.f32.mrb[63].mxu0  ;;  %4682 = vmatprep.subr.bf16.mxu0 %v5279_v0 }
 0xa4c   :  { %2044 = vrot.lane.b32.xlu0 %v5830_v56, %s5285_s2  ;;  %3795 = vrot.lane.b32.xlu1 %v3385_v61, %s5289_s6 }
 0xa50   :  { %3305 = vrot.lane.b32.xlu0 %v5970_v13, %s5285_s2  ;;  %3301 = vrot.lane.b32.xlu1 %v2934_v63, %s5273_s22 }
 0xa54   :  { %2052 = vrot.lane.b32.xlu0 %v5771_v20, %s5286_s24  ;;  %2046 = vrot.lane.b32.xlu1 %v5832_v62, %s5285_s2 }
 0xa58   :  { %2054 = vrot.lane.b32.xlu1 %v5773_v22, %s5286_s24  ;;  %3309 = vrot.lane.b32.xlu0 %v3114_v21, %s5287_s15 }
 0xa5c   :  { %2062 = vrot.lane.b32.xlu1 %v5853_v14, %s5284_s27  ;;  %2060 = vrot.lane.b32.xlu0 %v5846_v9, %s5284_s27  ;;  %v3294_v56 = vpop.f32.mrb[64].mxu0 }
 0xa5d   :  { %v4644_v13 = vpop.f32.mrb[65].mxu0 }
 0xa5e   :  { %v3297_v27 = vpop.f32.mrb[66].mxu0 }
 0xa5f   :  { %v4645_v28 = vpop.f32.mrb[67].mxu0 }
 0xa60   :  { %2070 = vrot.lane.b32.xlu1 %v5828_v53, %s5267_s30  ;;  %3313 = vrot.lane.b32.xlu0 %v3204_v57, %s5286_s24 }
 0xa64   :  { %2068 = vrot.lane.b32.xlu0 %v5826_v51, %s5267_s30  ;;  %s5303_s30 = smov [#allocation21]  }
 0xa68   :  { %3317 = vrot.lane.b32.xlu0 %v3294_v56, %s5288_s5 }
 0xa6c   :  { %2076 = vrot.lane.b32.xlu0 %v5868_v19, %s5283_s20 }
 0xaa8   :  { %v3526_v20 = vpop.permute.xlu0 %3525 }
 0xaae   :  { %v3661_v22 = vpop.permute.xlu0 %3660  ;;  %v3480_v62 = vpop.permute.xlu1 %3479 }
 0xaaf   :  { %4667 = vmatmul.mubr.msk.bf16.vlgmr.msra.gmra.mrb[68].mxu1 %vm2737_vm12, %v3480_v62 }
 0xab0   :  { %4671 = vmatpush3.bf16.msra.mxu1 %v5984_v50  ;;  %4672 = vmatprep.mubr.msk.bf16.mxu1 %vm5280_vm0, %v5279_v0 }
 0xab1   :  { %4688 = vmatprep.subr.bf16.mxu1 %v5279_v0 }
 0xab2   :  { %v3706_v53 = vpop.permute.xlu0 %3705  ;;  %v3571_v9 = vpop.permute.xlu1 %3570 }
 0xab3   :  { %4679 = vmatmul.mubr.msk.bf16.vlgmr.msra.gmra.mrb[72].mxu0 %vm2737_vm12, %v3571_v9 }
 0xab4   :  { %4683 = vmatpush3.bf16.msra.mxu0 %v5984_v50  ;;  %4684 = vmatprep.mubr.msk.bf16.mxu0 %vm5280_vm0, %v5279_v0 }
 0xab5   :  { %4700 = vmatprep.subr.bf16.mxu0 %v5279_v0 }
 0xab6   :  { %v3841_v51 = vpop.permute.xlu0 %3840  ;;  %v3616_v14 = vpop.permute.xlu1 %3615 }
 0xaba   :  { %v3886_v19 = vpop.permute.xlu0 %3885  ;;  %v3751_v29 = vpop.permute.xlu1 %3750 }
 0xabb   :  { %4673 = vmatmul.mubr.msk.bf16.vlgmr.msra.gmra.mrb[68].mxu1 %vm2737_vm12, %v3526_v20 }
 0xabc   :  { %4689 = vmatpush3.bf16.msra.mxu1 %v5984_v50  ;;  %4690 = vmatprep.mubr.msk.bf16.mxu1 %vm5280_vm0, %v5279_v0 }
 0xabd   :  { %4694 = vmatprep.subr.bf16.mxu1 %v5279_v0 }
 0xabe   :  { %v2045_v30 = vpop.permute.xlu0 %2044  ;;  %v3796_v17 = vpop.permute.xlu1 %3795 }
 0xabf   :  { %v2082_v31 = vsel %vm193_vm1, %v5761_v16, %v2045_v30  ;;  %4685 = vmatmul.mubr.msk.bf16.vlgmr.msra.gmra.mrb[72].mxu0 %vm2737_vm12, %v3616_v14 }
 0xac0   :  { %4701 = vmatpush3.bf16.msra.mxu0 %v5984_v50  ;;  %4702 = vmatprep.mubr.msk.bf16.mxu0 %vm5280_vm0, %v5279_v0 }
 0xac1   :  { %4706 = vmatprep.subr.bf16.mxu0 %v5279_v0 }
 0xac2   :  { %v3306_v32 = vpop.permute.xlu0 %3305  ;;  %v3302_v34 = vpop.permute.xlu1 %3301 }
 0xac3   :  { %4691 = vmatmul.mubr.msk.bf16.vlgmr.msra.gmra.mrb[72].mxu1 %vm2737_vm12, %v3661_v22 }
 0xac4   :  { %4695 = vmatpush3.bf16.msra.mxu1 %v5984_v50  ;;  %4696 = vmatprep.mubr.msk.bf16.mxu1 %vm5280_vm0, %v5279_v0 }
 0xac5   :  { %4712 = vmatprep.subr.bf16.mxu1 %v5279_v0 }
 0xac6   :  { %v2053_v16 = vpop.permute.xlu0 %2052  ;;  %v2047_v35 = vpop.permute.xlu1 %2046 }
 0xac7   :  { %v2084_v36 = vsel %vm812_vm5, %v2082_v31, %v2053_v16  ;;  %4703 = vmatmul.mubr.msk.bf16.vlgmr.msra.gmra.mrb[76].mxu0 %vm2737_vm12, %v3751_v29  ;;  %v2083_v39 = vsel %vm193_vm1, %v5765_v18, %v2047_v35  ;;  %v3320_v18 = vsel %vm807_vm3, %v5962_v6, %v3302_v34 }
 0xac8   :  { %4707 = vmatpush3.bf16.msra.mxu0 %v5984_v50  ;;  %4708 = vmatprep.mubr.msk.bf16.mxu0 %vm5280_vm0, %v5279_v0  ;;  %v3321_v52 = vsel %vm193_vm1, %v3320_v18, %v3306_v32 }
 0xaca   :  { %v2055_v37 = vpop.permute.xlu1 %2054  ;;  %v3310_v38 = vpop.permute.xlu0 %3309 }
 0xacb   :  { %v2085_v41 = vsel %vm812_vm5, %v2083_v39, %v2055_v37  ;;  %v3322_v46 = vsel %vm810_vm4, %v3321_v52, %v3310_v38 }
 0xace   :  { %v2063_v42 = vpop.permute.xlu1 %2062  ;;  %v2061_v43 = vpop.permute.xlu0 %2060 }
 0xacf   :  { %v6090_v44 = vsel %vm2086_vm7, %v2085_v41, %v2063_v42  ;;  %v2087_v45 = vsel %vm2086_vm7, %v2084_v36, %v2061_v43  ;;  %4697 = vmatmul.mubr.msk.bf16.vlgmr.msra.gmra.mrb[72].mxu1 %vm2737_vm12, %v3706_v53 }
 0xad0   :  { %4713 = vmatpush3.bf16.msra.mxu1 %v5984_v50  ;;  %4714 = vmatprep.mubr.msk.bf16.mxu1 %vm5280_vm0, %v5279_v0 }
 0xad1   :  { %4718 = vmatprep.subr.bf16.mxu1 %v5279_v0 }
 0xad2   :  { %v3314_v47 = vpop.permute.xlu0 %3313 }
 0xad3   :  { %4709 = vmatmul.mubr.msk.bf16.vlgmr.msra.gmra.mrb[76].mxu0 %vm2737_vm12, %v3796_v17  ;;  %v3323_v54 = vsel %vm812_vm5, %v3322_v46, %v3314_v47 }
 0xad6   :  { %v2069_v48 = vpop.permute.xlu0 %2068 }
 0xad7   :  { %v6102_v49 = vsel %vm2089_vm11, %v2087_v45, %v2069_v48  ;;  %4715 = vmatmul.mubr.msk.bf16.vlgmr.msra.gmra.mrb[76].mxu1 %vm2737_vm12, %v3841_v51 }
 0xad8   :  { %4719 = vmatpush3.bf16.msra.mxu1 %v5984_v50  ;;  %4720 = vmatprep.mubr.msk.bf16.mxu1 %vm5280_vm0, %v5279_v0 }
 0xada   :  { %v3318_v55 = vpop.permute.xlu0 %3317 }
 0xadb   :  { %v3324_v6 = vsel %vm814_vm6, %v3323_v54, %v3318_v55 }
 0xadc   :  { %v3325_v57 = vadd.f32 0.5, %v3324_v6 }
 0xade   :  { %v3326_v58 = vfloor.f32 %v3325_v57 }
 0xae0   :  { %v3327_v59 = vmax.f32 %v3326_v58, 0.0 }
 0xae2   :  { %v3328_v60 = vmin.f32 %v3327_v59, 255.0 }
 0xae3   :  { %4721 = vmatmul.mubr.msk.bf16.vlgmr.msra.gmra.mrb[76].mxu1 %vm2737_vm12, %v3886_v19 }
 0xae4   :  { %v3329_v33 = vpack.c.bf16 %v3328_v60, %v3328_v60 }
 0xae6   :  { %v3330_v61 = vsub.bf16 %v5624_v10, %v3329_v33 }
 0xae8   :  { %v3331_v50 = vunpack.c.l.bf16 %v3330_v61 }
 0xaea   :  { %v3332_v63 = vmax.f32 %v3331_v50, 0.0 }
 0xaec   :  { %v3333_v1 = vmin.f32 %v3332_v63, 255.0 }
 0xaee   :  { %v3334_v0 = vmul.f32 0.003921569, %v3333_v1 }
 0xaf0   :  { %3335 = vst.msk [vmem:[#allocation21] sm:$0xff] %vm2086_vm7, %v3334_v0 }
 0xb1c   :  { %v6115_v2 = vpop.f32.mrb[68].mxu0 }
 0xb1d   :  { %v4662_v3 = vpop.f32.mrb[69].mxu0 }
 0xb1e   :  { %v3475_v4 = vpop.f32.mrb[70].mxu0 }
 0xb1f   :  { %v4663_v5 = vpop.f32.mrb[71].mxu0 }
 0xb8e   :  { %v3564_v7 = vpop.f32.mrb[68].mxu1 }
 0xb8f   :  { %v4674_v8 = vpop.f32.mrb[69].mxu1  ;;  %3931 = vrot.lane.b32.xlu1 %v3564_v7, %s5268_s21  ;;  %s3989_s21 = sshll.u32 %s5303_s30, 4  ;;  %s3990_s21 = int_to_ptr.vmem [resolvable:$true] %s3989_s21 }
 0xb90   :  { %v3567_v12 = vpop.f32.mrb[70].mxu1  ;;  %s5158_s23 = scalar_lea.vmem %s3990_s21, 128  ;;  %p5163_p5 = scmp.lt.s32.totalorder %s3990_s21, %s3990_s21 }
 0xb91   :  { %v4675_v15 = vpop.f32.mrb[71].mxu1  ;;  %p5159_p4 = scmp.ne.s32.totalorder %s3990_s21, %s5158_s23  ;;  %p5164_p6 = scmp.lt.s32.totalorder %s5158_s23, %s5158_s23 }
 0xb92   :  { %v3654_v21 = vpop.f32.mrb[72].mxu0 }
 0xb93   :  { %3935 = vrot.lane.b32.xlu1 %v3654_v21, %s5273_s22  ;;  %v4686_v10 = vpop.f32.mrb[73].mxu0  ;;  %p5165_p7 = por %p5164_p6, %p5163_p5 }
 0xb94   :  { %v3657_v24 = vpop.f32.mrb[74].mxu0 }
 0xb95   :  { %v4687_v25 = vpop.f32.mrb[75].mxu0  ;;  %p5166_p8 = pnand %p5165_p7, %p5159_p4 }
 0xba2   :  { %v3744_v26 = vpop.f32.mrb[72].mxu1 }
 0xba3   :  { %v4698_v56 = vpop.f32.mrb[73].mxu1  ;;  %3939 = vrot.lane.b32.xlu1 %v3744_v26, %s5292_s0 }
 0xba4   :  { %v3747_v13 = vpop.f32.mrb[74].mxu1 }
 0xba5   :  { %v4699_v27 = vpop.f32.mrb[75].mxu1 }
 0xba6   :  { %v3834_v28 = vpop.f32.mrb[76].mxu0 }
 0xba7   :  { %3943 = vrot.lane.b32.xlu1 %v3834_v28, %s5285_s2  ;;  %v4710_v20 = vpop.f32.mrb[77].mxu0 }
 0xba8   :  { %v3837_v22 = vpop.f32.mrb[78].mxu0 }
 0xba9   :  { %v4711_v62 = vpop.f32.mrb[79].mxu0 }
 0xbab   :  { %2078 = vrot.lane.b32.xlu1 %v5870_v23, %s5283_s20 }
 0xbb6   :  { %v3924_v53 = vpop.f32.mrb[76].mxu1 }
 0xbb7   :  { %v4722_v9 = vpop.f32.mrb[77].mxu1  ;;  %3947 = vrot.lane.b32.xlu0 %v3924_v53, %s5293_s29 }
 0xbb8   :  { %v3927_v51 = vpop.f32.mrb[78].mxu1 }
 0xbb9   :  { %v4723_v14 = vpop.f32.mrb[79].mxu1 }
 0xbba   :  { %5169 = shalt.err (!%p5166_p8)
}
 0xbbb   :  { %s5170_s20 = scalar_lea.hbm %s6198_s12, 128 }
 0xbbc   :  { %p5171_p9 = scmp.ne.s32.totalorder %s6198_s12, %s5170_s20  ;;  %p5174_p10 = scmp.lt.u32.totalorder %s5170_s20, %s6198_s12 }
 0xbbe   :  { %p5176_p11 = pnand %p5174_p10, %p5171_p9 }
 0xbc0   :  { %5179 = shalt.err (!%p5176_p11)
}
 0xbc1   :  { %3992 = dma.vmem_to_hbm [thread:$0]  %s3990_s21, 128, %s6198_s12, [#allocation22]  }
 0xbc2   :  { %s5304_s16 = smov [#allocation24]  }
 0xbc3   :  { %s4009_s17 = sshll.u32 %s5304_s16, 4  ;;  %s4010_s17 = int_to_ptr.vmem [resolvable:$true] %s4009_s17 }
 0xbc4   :  { %s5180_s0 = scalar_lea.vmem %s4010_s17, 32  ;;  %p5185_p13 = scmp.lt.s32.totalorder %s4010_s17, %s4010_s17 }
 0xbc5   :  { %p5181_p12 = scmp.ne.s32.totalorder %s4010_s17, %s5180_s0  ;;  %p5186_p0 = scmp.lt.s32.totalorder %s5180_s0, %s5180_s0 }
 0xbc7   :  { %p5187_p1 = por %p5186_p0, %p5185_p13 }
 0xbc9   :  { %p5188_p2 = pnand %p5187_p1, %p5181_p12 }
 0xbcb   :  { %5191 = shalt.err (!%p5188_p2)
}
 0xbcc   :  { %s5192_s3 = scalar_lea.hbm %s6200_s14, 32 }
 0xbcd   :  { %p5193_p3 = scmp.ne.s32.totalorder %s6200_s14, %s5192_s3  ;;  %p5196_p4 = scmp.lt.u32.totalorder %s5192_s3, %s6200_s14 }
 0xbcf   :  { %p5198_p5 = pnand %p5196_p4, %p5193_p3 }
 0xbd1   :  { %5201 = shalt.err (!%p5198_p5)
}
 0xbd2   :  { %4012 = dma.vmem_to_hbm [thread:$0]  %s4010_s17, 32, %s6200_s14, [#allocation25]   ;;  %v2071_v23 = vpop.permute.xlu1 %2070  ;;  %vm2092_vm0 = vcmask 654336   ;;  %v2077_v30 = vpop.permute.xlu0 %2076 }
 0xbd3   :  { %v2093_v31 = vsel %vm2092_vm0, %v6102_v49, %v2077_v30  ;;  %v2091_v16 = vsel %vm2089_vm11, %v6090_v44, %v2071_v23  ;;  %s5305_s14 = smov [#allocation20]  }
 0xbd4   :  { %v2095_v32 = vadd.f32 0.5, %v2093_v31  ;;  %s3976_s8 = sshll.u32 %s5305_s14, 4  ;;  %s3977_s8 = int_to_ptr.vmem [resolvable:$true] %s3976_s8 }
 0xbd5   :  { %s5202_s28 = scalar_lea.vmem %s3977_s8, 256  ;;  %p5207_p7 = scmp.lt.s32.totalorder %s3977_s8, %s3977_s8 }
 0xbd6   :  { %v2097_v35 = vfloor.f32 %v2095_v32  ;;  %p5203_p6 = scmp.ne.s32.totalorder %s3977_s8, %s5202_s28  ;;  %p5208_p8 = scmp.lt.s32.totalorder %s5202_s28, %s5202_s28 }
 0xbd8   :  { %v2099_v39 = vmax.f32 %v2097_v35, 0.0  ;;  %p5209_p9 = por %p5208_p8, %p5207_p7 }
 0xbda   :  { %v2101_v43 = vmin.f32 %v2099_v39, 255.0  ;;  %p5210_p10 = pnand %p5209_p9, %p5203_p6 }
 0xc01   :  { %v3932_v19 = vpop.permute.xlu1 %3931 }
 0xc02   :  { %v3950_v47 = vsel %vm1456_vm8, %v6115_v2, %v3932_v19 }
 0xc05   :  { %v3936_v29 = vpop.permute.xlu1 %3935 }
 0xc06   :  { %v3951_v18 = vsel %vm807_vm3, %v3950_v47, %v3936_v29  ;;  %vm2113_vm3 = vcmask 785408  }
 0xc15   :  { %v3940_v17 = vpop.permute.xlu1 %3939 }
 0xc16   :  { %v3952_v49 = vsel %vm1459_vm9, %v3951_v18, %v3940_v17 }
 0xc19   :  { %v3944_v34 = vpop.permute.xlu1 %3943 }
 0xc1a   :  { %v3953_v52 = vsel %vm193_vm1, %v3952_v49, %v3944_v34 }
 0xc1d   :  { %v2079_v36 = vpop.permute.xlu1 %2078 }
 0xc1e   :  { %v2094_v37 = vsel %vm2092_vm0, %v2091_v16, %v2079_v36 }
 0xc1f   :  { %v2096_v38 = vadd.f32 0.5, %v2094_v37 }
 0xc21   :  { %v2098_v41 = vfloor.f32 %v2096_v38 }
 0xc23   :  { %v2100_v42 = vmax.f32 %v2098_v41, 0.0 }
 0xc25   :  { %v2102_v45 = vmin.f32 %v2100_v42, 255.0 }
 0xc27   :  { %v2103_v48 = vpack.c.bf16 %v2102_v45, %v2101_v43 }
 0xc29   :  { %v2104_v44 = vsub.bf16 %v5532_v11, %v2103_v48  ;;  %v3948_v46 = vpop.permute.xlu0 %3947 }
 0xc2a   :  { %v3954_v54 = vsel %vm1462_vm10, %v3953_v52, %v3948_v46 }
 0xc2b   :  { %v3955_v55 = vadd.f32 0.5, %v3954_v54  ;;  %v2105_v6 = vunpack.c.l.bf16 %v2104_v44  ;;  %v2106_v57 = vunpack.c.h.bf16 %v2104_v44 }
 0xc2d   :  { %v3956_v58 = vfloor.f32 %v3955_v55  ;;  %v2107_v59 = vmax.f32 %v2105_v6, 0.0  ;;  %v2108_v60 = vmax.f32 %v2106_v57, 0.0 }
 0xc2f   :  { %v3957_v33 = vmax.f32 %v3956_v58, 0.0  ;;  %v2109_v61 = vmin.f32 %v2107_v59, 255.0  ;;  %v2110_v50 = vmin.f32 %v2108_v60, 255.0 }
 0xc31   :  { %v3958_v63 = vmin.f32 %v3957_v33, 255.0  ;;  %v2111_v1 = vmul.f32 0.003921569, %v2109_v61  ;;  %v2112_v0 = vmul.f32 0.003921569, %v2110_v50 }
 0xc33   :  { %v3959_v11 = vpack.c.bf16 %v3958_v63, %v3958_v63  ;;  %2114 = vst.msk [vmem:[#allocation20] sm:$0xff] %vm2113_vm3, %v2111_v1  ;;  %2115 = vst.msk [vmem:[#allocation20 + $0x8] sm:$0xff] %vm2113_vm3, %v2112_v0 }
 0xc34   :  { %5213 = shalt.err (!%p5210_p10)
}
 0xc35   :  { %s5214_s23 = scalar_lea.hbm %s6197_s11, 256 }
 0xc36   :  { %p5215_p11 = scmp.ne.s32.totalorder %s6197_s11, %s5214_s23  ;;  %p5218_p12 = scmp.lt.u32.totalorder %s5214_s23, %s6197_s11 }
 0xc38   :  { %p5220_p13 = pnand %p5218_p12, %p5215_p11 }
 0xc3a   :  { %5223 = shalt.err (!%p5220_p13)
}
 0xc3b   :  { %3982 = dma.vmem_to_hbm [thread:$0]  %s3977_s8, 256, %s6197_s11, [#allocation4], %s5272_s9, %s5272_s9, %s5273_s22   ;;  %v3960_v2 = vsub.bf16 %v5788_v40, %v3959_v11  ;;  %vm3965_vm1 = vcmask 191488  }
 0xc3c   :  { %s5306_s15 = smov [#allocation23]  }
 0xc3d   :  { %v3961_v3 = vunpack.c.l.bf16 %v3960_v2  ;;  %s3999_s5 = sshll.u32 %s5306_s15, 4  ;;  %s4000_s5 = int_to_ptr.vmem [resolvable:$true] %s3999_s5 }
 0xc3e   :  { %s5224_s6 = scalar_lea.vmem %s4000_s5, 64  ;;  %p5229_p1 = scmp.lt.s32.totalorder %s4000_s5, %s4000_s5 }
 0xc3f   :  { %v3962_v4 = vmax.f32 %v3961_v3, 0.0  ;;  %p5225_p0 = scmp.ne.s32.totalorder %s4000_s5, %s5224_s6  ;;  %p5230_p2 = scmp.lt.s32.totalorder %s5224_s6, %s5224_s6 }
 0xc41   :  { %v3963_v5 = vmin.f32 %v3962_v4, 255.0  ;;  %p5231_p3 = por %p5230_p2, %p5229_p1 }
 0xc43   :  { %v3964_v7 = vmul.f32 0.003921569, %v3963_v5  ;;  %p5232_p4 = pnand %p5231_p3, %p5225_p0 }
 0xc45   :  { %3966 = vst.msk [vmem:[#allocation23] sm:$0xf] %vm3965_vm1, %v3964_v7 }
 0xc46   :  { %5235 = shalt.err (!%p5232_p4)
}
 0xc47   :  { %s5236_s9 = scalar_lea.hbm %s6199_s13, 64 }
 0xc48   :  { %p5237_p5 = scmp.ne.s32.totalorder %s6199_s13, %s5236_s9  ;;  %p5240_p6 = scmp.lt.u32.totalorder %s5236_s9, %s6199_s13 }
 0xc4a   :  { %p5242_p7 = pnand %p5240_p6, %p5237_p5 }
 0xc4c   :  { %5245 = shalt.err (!%p5242_p7)
}
 0xc4d   :  { %4002 = dma.vmem_to_hbm [thread:$0]  %s4000_s5, 64, %s6199_s13, [#allocation22]  }
 0xc4e   :  { %5258 = dma.done.wait [#allocation4], 256  }
 0xc4f   :  { %5259 = vsyncadd [#allocation4], 4294967040 }
 0xc50   :  { %5260 = dma.done.wait [#allocation22], 192  }
 0xc51   :  { %5261 = vsyncadd [#allocation22], 4294967104 }
 0xc52   :  { %5262 = dma.done.wait [#allocation25], 32  }
 0xc53   :  { %5263 = vsyncadd [#allocation25], 4294967264 }
 0xc54   :  { %4025 = vsyncpa [#allocation3], 1 }
 0xc55   :  { %4026 = vsyncpa [#allocation6], 1 }
 0xc56   :  { %4027 = vsyncpa [#allocation9], 1 }
 0xc57   :  { %4028 = vsyncpa [#allocation12], 1 }
 0xc58   :  { %4029 = vsyncpa [#allocation15], 1 }
 0xc59   :  { %4030 = vsyncpa [#allocation18], 1 }
 0xc5a   :  { %4031 = vsyncpa [#allocation4], 1 }
 0xc5b   :  { %4032 = vsyncpa [#allocation22], 1 }
 0xc5c   :  { %4033 = vsyncpa [#allocation25], 1 }

</bundles_post_ra>
